<compile_context>
chip_gen: v6e
topology: v6e:2x2x1
jax: 0.10.0
libtpu: 0.0.40
codegen_flags: <defaults>
</compile_context>

<pallas_src>
import functools
import math

import jax
import jax.numpy as jnp
from jax.experimental import pallas as pl
from jax.experimental.pallas import tpu as pltpu

LANE = 128  # TPU lane width; all feature dims are zero-padded to this.


def _actnorm_affine(x, b_param, logs_param, scale=1.0, logscale_factor=3.0):
    """Return (t, s), each (1, P), so that actnorm forward is y = (x + t) * s.

    One-pass stats: var = E[x^2] - mean^2;  log(scale/(sqrt(v)+1e-6)) is
    rewritten as log(scale) - 0.5*log(v + 1e-12) (difference ~1e-6, far below
    the comparison tolerance). Matches torch actnorm first-call semantics.
    """
    x_mean = jnp.mean(x, axis=0, keepdims=True)                    # (1, P)
    x_sqmean = jnp.mean(x * x, axis=0, keepdims=True)              # (1, P)
    x_var = jnp.maximum(x_sqmean - x_mean * x_mean, 0.0)           # (1, P), >= 0
    t = b_param - x_mean                                           # b + b_init
    logs = jnp.clip(
        logs_param
        + (math.log(scale) - 0.5 * jnp.log(x_var + 1e-12)) / logscale_factor,
        -5.0, 5.0)
    s = jnp.exp(logs)        # exp/log on a single (1, P) row -> EUP, no blowup
    return t, s


def _make_decoder_kernel(n_linear, n_actnorm, n_out_dim):
    """Refs: (x, w_packed, b_packed, an_packed, exp_alpha[SMEM], out)."""

    def kernel(x_ref, w_ref, b_ref, an_ref, ea_ref, out_ref):
        wdt = w_ref.dtype                                          # bf16 weights
        x = x_ref[...]                                             # (N, P) f32

        # x = linear[0](x)   (activation cast to bf16 only at the dot input)
        x = (jnp.dot(x.astype(wdt), w_ref[0], preferred_element_type=jnp.float32)
             + b_ref[0:1, :])

        # residual blocks: x = x + linear[i](relu(actnorm[i-1](x)))
        for i in range(1, n_linear - 1):
            t, s = _actnorm_affine(
                x,
                an_ref[i - 1:i, :],                                # actnorm b
                an_ref[n_actnorm + i - 1:n_actnorm + i, :],        # actnorm logs
            )
            y = jnp.maximum((x + t) * s, 0.0)
            x = x + (jnp.dot(y.astype(wdt), w_ref[i],
                             preferred_element_type=jnp.float32)
                     + b_ref[i:i + 1, :])

        # tail: actnorm[-1] -> relu -> linear[-1]
        t, s = _actnorm_affine(
            x,
            an_ref[n_actnorm - 1:n_actnorm, :],
            an_ref[2 * n_actnorm - 1:2 * n_actnorm, :],
        )
        y = jnp.maximum((x + t) * s, 0.0)
        y = (jnp.dot(y.astype(wdt), w_ref[n_linear - 1],
                     preferred_element_type=jnp.float32)
             + b_ref[n_linear - 1:n_linear, :])

        # Fused head: lanes [0, n_out) = mean = y; lanes >= n_out use the std
        # expression (lanes [n_out, 2*n_out) are the real std; rest is unused).
        lane = jax.lax.broadcasted_iota(jnp.int32, y.shape, 1)
        std = ea_ref[0] * (1.0 + 0.99 * jnp.tanh(y))
        out_ref[...] = jnp.where(lane < n_out_dim, y, std)

    return kernel


@functools.partial(jax.jit, static_argnames=("n_out_dim",))
def vae_decoder_forward_pallas(x, w_packed, b_packed, an_packed, alpha, *, n_out_dim):
    """x: (B, N, n_dim) stacked independent decoder instances."""
    B, N, d_in = x.shape
    n_linear = w_packed.shape[0]
    n_actnorm = an_packed.shape[0] // 2
    P = w_packed.shape[-1]

    # Zero-pad input features to lane width (padded lanes stay exactly zero
    # through the whole network because all W/b/actnorm padding is zero).
    x_pad = jnp.zeros((B, N, P), dtype=jnp.float32).at[:, :, :d_in].set(
        x.astype(jnp.float32))

    # exp(alpha) precomputed once; rides into the kernel as an SMEM scalar.
    exp_alpha = jnp.exp(alpha.astype(jnp.float32)).reshape((1,))

    kernel = _make_decoder_kernel(n_linear, n_actnorm, n_out_dim)

    flops = 2 * B * N * P * P * n_linear
    transcendentals = B * (N * P + 3 * n_actnorm * P)   # tanh + per-actnorm log/exp
    bytes_accessed = (w_packed.size * w_packed.dtype.itemsize
                      + 4 * (b_packed.size + an_packed.size)
                      + 4 * 2 * B * N * P)

    out = pl.pallas_call(
        kernel,
        out_shape=jax.ShapeDtypeStruct((B, N, P), jnp.float32),
        grid=(B,),
        in_specs=[
            pl.BlockSpec((None, N, P), lambda b: (b, 0, 0)),      # per-instance x
            pl.BlockSpec((n_linear, P, P), lambda b: (0, 0, 0)),  # weights, resident
            pl.BlockSpec((n_linear, P), lambda b: (0, 0)),        # biases, resident
            pl.BlockSpec((2 * n_actnorm, P), lambda b: (0, 0)),   # actnorm, resident
            pl.BlockSpec(memory_space=pltpu.MemorySpace.SMEM),    # exp(alpha) scalar
        ],
        out_specs=pl.BlockSpec((None, N, P), lambda b: (b, 0, 0)),
        compiler_params=pltpu.CompilerParams(dimension_semantics=("parallel",)),
        cost_estimate=pl.CostEstimate(flops=flops,
                                      transcendentals=transcendentals,
                                      bytes_accessed=bytes_accessed),
    )(x_pad, w_packed, b_packed, an_packed, exp_alpha)

    mean = out[:, :, :n_out_dim]
    std = out[:, :, n_out_dim:2 * n_out_dim]
    return mean, std


# ----------------------------------------------------------------------------
# Parameter init (matches torch: xavier_normal_ gain=1, zero biases, zero
# actnorm b/logs, zero alpha) and lane-dense packing.
# ----------------------------------------------------------------------------
def init_vae_decoder_params(key, n_dim, n_out_dim, n_depth, n_width):
    layers = [n_dim] + n_depth * [n_width] + [2 * n_out_dim]
    n_linear = len(layers) - 1
    n_actnorm = len(layers) - 2
    Ws, bs = [], []
    keys = jax.random.split(key, n_linear)
    for i in range(n_linear):
        fan_in, fan_out = layers[i], layers[i + 1]
        std = math.sqrt(2.0 / (fan_in + fan_out))  # xavier_normal_, gain=1
        Ws.append(std * jax.random.normal(keys[i], (fan_in, fan_out), dtype=jnp.float32))
        bs.append(jnp.zeros((fan_out,), dtype=jnp.float32))
    an_b = jnp.zeros((n_actnorm, n_width), dtype=jnp.float32)
    an_logs = jnp.zeros((n_actnorm, n_width), dtype=jnp.float32)
    alpha = jnp.zeros((1,), dtype=jnp.float32)
    return layers, Ws, bs, an_b, an_logs, alpha


def pack_decoder_params(Ws, bs, an_b, an_logs, lane=LANE, w_dtype=jnp.bfloat16):
    """Pack params into 3 zero-padded, lane-dense slabs (once, host side).

    Weights are stored in bf16 (single MXU pass on v5e/v6e, half the bytes);
    biases / actnorm params stay f32 (added / applied in the f32 VPU path).
    """
    n_linear = len(Ws)
    n_actnorm = an_b.shape[0]
    assert all(max(W.shape) <= lane for W in Ws), "feature dims must fit one lane block"

    w_packed = jnp.zeros((n_linear, lane, lane), dtype=jnp.float32)
    b_packed = jnp.zeros((n_linear, lane), dtype=jnp.float32)
    for i, (W, b) in enumerate(zip(Ws, bs)):
        di, do = W.shape
        w_packed = w_packed.at[i, :di, :do].set(W)
        b_packed = b_packed.at[i, :do].set(b)
    w_packed = w_packed.astype(w_dtype)   # 0.0 -> bf16 0.0 exactly

    # Assert the zero-padding invariant (padded lanes must be exactly inert).
    for i, W in enumerate(Ws):
        di, do = W.shape
        assert float(jnp.abs(w_packed[i, di:, :].astype(jnp.float32)).max()) == 0.0
        assert float(jnp.abs(w_packed[i, :, do:].astype(jnp.float32)).max()) == 0.0

    an_packed = jnp.zeros((2 * n_actnorm, lane), dtype=jnp.float32)
    an_packed = an_packed.at[:n_actnorm, :an_b.shape[1]].set(an_b)
    an_packed = an_packed.at[n_actnorm:, :an_logs.shape[1]].set(an_logs)
    return w_packed, b_packed, an_packed


# ----------------------------------------------------------------------------
# Pure-JAX f32 reference (mirrors the torch forward exactly, first-call init).
# ----------------------------------------------------------------------------
def _actnorm_ref(x, b, logs, scale=1.0, logscale_factor=3.0):
    x_mean = jnp.mean(x, axis=0, keepdims=True)
    x_var = jnp.mean(jnp.square(x - x_mean), axis=0, keepdims=True)
    y = x + (b + (-x_mean))
    y = y * jnp.exp(jnp.clip(
        logs + jnp.log(scale / (jnp.sqrt(x_var) + 1e-6)) / logscale_factor, -5.0, 5.0))
    return y


def vae_decoder_forward_ref(x, Ws, bs, an_b, an_logs, alpha, n_out_dim):
    n_linear = len(Ws)
    h = x @ Ws[0] + bs[0]
    for i in range(1, n_linear - 1):
        y = _actnorm_ref(h, an_b[i - 1], an_logs[i - 1])
        y = jnp.maximum(y, 0.0)
        h = h + (y @ Ws[i] + bs[i])
    y = _actnorm_ref(h, an_b[-1], an_logs[-1])
    y = jnp.maximum(y, 0.0)
    y = y @ Ws[-1] + bs[-1]
    mean = y[:, :n_out_dim]
    std = jnp.exp(alpha) * (1.0 + 0.99 * jnp.tanh(y[:, n_out_dim:]))
    return mean, std


if __name__ == "__main__":
    # VAE_decoder(n_dim=8, n_out_dim=4, n_depth=3, n_width=32);
    # B=2 independent decoder instances, each with a batch of N=128 rows
    # (fills the 128-row MXU per grid step; grid parallel across TCs on v7x).
    n_dim, n_out_dim, n_depth, n_width = 8, 4, 3, 32
    B, N = 2, 128

    key = jax.random.PRNGKey(0)
    k_x, k_p = jax.random.split(key)

    layers, Ws, bs, an_b, an_logs, alpha = init_vae_decoder_params(
        k_p, n_dim, n_out_dim, n_depth, n_width)
    x = jax.random.normal(k_x, (B, N, n_dim), dtype=jnp.float32)

    w_packed, b_packed, an_packed = pack_decoder_params(Ws, bs, an_b, an_logs)

    mean, std = vae_decoder_forward_pallas(
        x, w_packed, b_packed, an_packed, alpha, n_out_dim=n_out_dim)
    mean = jax.block_until_ready(mean)
    std = jax.block_until_ready(std)

    means_ref, stds_ref = [], []
    for b_idx in range(B):   # per-instance reference (actnorm stats per instance)
        m_r, s_r = vae_decoder_forward_ref(
            x[b_idx], Ws, bs, an_b, an_logs, alpha, n_out_dim)
        means_ref.append(m_r)
        stds_ref.append(s_r)
    mean_ref = jax.block_until_ready(jnp.stack(means_ref))
    std_ref = jax.block_until_ready(jnp.stack(stds_ref))

    assert mean.shape == (B, N, n_out_dim), mean.shape
    assert std.shape == (B, N, n_out_dim), std.shape
    # bf16 MXU operands vs f32 reference -> relaxed tolerance (per perf review).
    assert jnp.allclose(mean, mean_ref, rtol=5e-2, atol=5e-2), "mean mismatch vs JAX reference"
    assert jnp.allclose(std, std_ref, rtol=5e-2, atol=5e-2), "std mismatch vs JAX reference"
    print("KERNEL_OK")
</pallas_src>

<mosaic_0001>
module attributes {stable_mosaic.version = 11 : i64} {
  func.func @kernel(%arg0: i32, %arg1: memref<1x128x128xf32, #tpu.memory_space<vmem>>, %arg2: memref<4x128x128xbf16, #tpu.memory_space<vmem>>, %arg3: memref<4x128xf32, #tpu.memory_space<vmem>>, %arg4: memref<6x128xf32, #tpu.memory_space<vmem>>, %arg5: memref<1xf32, #tpu.memory_space<smem>>, %arg6: memref<1x128x128xf32, #tpu.memory_space<vmem>>) attributes {dimension_semantics = [#tpu.dimension_semantics<parallel>], iteration_bounds = array<i64: 2>, scalar_prefetch = 0 : i64, scratch_operands = 0 : i64, tpu.core_type = #tpu.core_type<tc>, window_params = [{transform_indices = @transform_0, window_bounds = array<i64: 1, 128, 128>}, {pipeline_mode = #tpu.pipeline_mode<synchronous>, transform_indices = @transform_1, window_bounds = array<i64: 4, 128, 128>}, {pipeline_mode = #tpu.pipeline_mode<synchronous>, transform_indices = @transform_2, window_bounds = array<i64: 4, 128>}, {pipeline_mode = #tpu.pipeline_mode<synchronous>, transform_indices = @transform_3, window_bounds = array<i64: 6, 128>}, {transform_indices = @transform_4, window_bounds = array<i64: 1>}, {transform_indices = @transform_5, window_bounds = array<i64: 1, 128, 128>}]} {
    %c0 = arith.constant 0 : index
    %c0_0 = arith.constant 0 : index
    %c0_1 = arith.constant 0 : index
    %0 = vector.load %arg1[%c0, %c0_0, %c0_1] : memref<1x128x128xf32, #tpu.memory_space<vmem>>, vector<1x128x128xf32>
    %1 = vector.shape_cast %0 : vector<1x128x128xf32> to vector<128x128xf32>
    %2 = arith.truncf %1 : vector<128x128xf32> to vector<128x128xbf16>
    %c0_2 = arith.constant 0 : index
    %c0_3 = arith.constant 0 : index
    %c0_4 = arith.constant 0 : index
    %3 = vector.load %arg2[%c0_2, %c0_3, %c0_4] : memref<4x128x128xbf16, #tpu.memory_space<vmem>>, vector<1x128x128xbf16>
    %4 = vector.shape_cast %3 : vector<1x128x128xbf16> to vector<128x128xbf16>
    %cst = arith.constant dense<0.000000e+00> : vector<128x128xf32>
    %5 = tpu.matmul %2, %4, %cst {dimension_numbers = #tpu.dot_dimension_numbers<[1], [0], [0], [1], [0, 0, 1, 1], [], []>} : vector<128x128xbf16>, vector<128x128xbf16>, vector<128x128xf32> -> vector<128x128xf32>
    %c0_5 = arith.constant 0 : index
    %c0_6 = arith.constant 0 : index
    %6 = vector.load %arg3[%c0_5, %c0_6] : memref<4x128xf32, #tpu.memory_space<vmem>>, vector<1x128xf32>
    %7 = vector.broadcast %6 : vector<1x128xf32> to vector<128x128xf32>
    %8 = arith.addf %5, %7 : vector<128x128xf32>
    %c0_7 = arith.constant 0 : index
    %c0_8 = arith.constant 0 : index
    %9 = vector.load %arg4[%c0_7, %c0_8] : memref<6x128xf32, #tpu.memory_space<vmem>>, vector<1x128xf32>
    %c3 = arith.constant 3 : index
    %c0_9 = arith.constant 0 : index
    %10 = vector.load %arg4[%c3, %c0_9] : memref<6x128xf32, #tpu.memory_space<vmem>>, vector<1x128xf32>
    %cst_10 = arith.constant dense<0.000000e+00> : vector<128xf32>
    %11 = vector.multi_reduction <add>, %8, %cst_10 [0] : vector<128x128xf32> to vector<128xf32>
    %12 = vector.shape_cast %11 : vector<128xf32> to vector<1x128xf32>
    %cst_11 = arith.constant 1.280000e+02 : f32
    %13 = vector.broadcast %cst_11 : f32 to vector<1x128xf32>
    %14 = arith.divf %12, %13 : vector<1x128xf32>
    %15 = arith.mulf %8, %8 : vector<128x128xf32>
    %cst_12 = arith.constant dense<0.000000e+00> : vector<128xf32>
    %16 = vector.multi_reduction <add>, %15, %cst_12 [0] : vector<128x128xf32> to vector<128xf32>
    %17 = vector.shape_cast %16 : vector<128xf32> to vector<1x128xf32>
    %cst_13 = arith.constant 1.280000e+02 : f32
    %18 = vector.broadcast %cst_13 : f32 to vector<1x128xf32>
    %19 = arith.divf %17, %18 : vector<1x128xf32>
    %20 = arith.mulf %14, %14 : vector<1x128xf32>
    %21 = arith.subf %19, %20 : vector<1x128xf32>
    %cst_14 = arith.constant 0.000000e+00 : f32
    %22 = vector.broadcast %cst_14 : f32 to vector<1x128xf32>
    %23 = arith.maximumf %21, %22 : vector<1x128xf32>
    %24 = arith.subf %9, %14 : vector<1x128xf32>
    %cst_15 = arith.constant 9.99999996E-13 : f32
    %25 = vector.broadcast %cst_15 : f32 to vector<1x128xf32>
    %26 = arith.addf %23, %25 : vector<1x128xf32>
    %27 = math.log %26 : vector<1x128xf32>
    %cst_16 = arith.constant 5.000000e-01 : f32
    %28 = vector.broadcast %cst_16 : f32 to vector<1x128xf32>
    %29 = arith.mulf %28, %27 : vector<1x128xf32>
    %cst_17 = arith.constant 0.000000e+00 : f32
    %30 = vector.broadcast %cst_17 : f32 to vector<1x128xf32>
    %31 = arith.subf %30, %29 : vector<1x128xf32>
    %cst_18 = arith.constant 3.000000e+00 : f32
    %32 = vector.broadcast %cst_18 : f32 to vector<1x128xf32>
    %33 = arith.divf %31, %32 : vector<1x128xf32>
    %34 = arith.addf %10, %33 : vector<1x128xf32>
    %cst_19 = arith.constant -5.000000e+00 : f32
    %cst_20 = arith.constant 5.000000e+00 : f32
    %35 = vector.broadcast %cst_19 : f32 to vector<1x128xf32>
    %36 = arith.maximumf %35, %34 : vector<1x128xf32>
    %37 = vector.broadcast %cst_20 : f32 to vector<1x128xf32>
    %38 = arith.minimumf %37, %36 : vector<1x128xf32>
    %39 = math.exp %38 : vector<1x128xf32>
    %40 = vector.broadcast %24 : vector<1x128xf32> to vector<128x128xf32>
    %41 = arith.addf %8, %40 : vector<128x128xf32>
    %42 = vector.broadcast %39 : vector<1x128xf32> to vector<128x128xf32>
    %43 = arith.mulf %41, %42 : vector<128x128xf32>
    %cst_21 = arith.constant 0.000000e+00 : f32
    %44 = vector.broadcast %cst_21 : f32 to vector<128x128xf32>
    %45 = arith.maximumf %43, %44 : vector<128x128xf32>
    %46 = arith.truncf %45 : vector<128x128xf32> to vector<128x128xbf16>
    %c1 = arith.constant 1 : index
    %c0_22 = arith.constant 0 : index
    %c0_23 = arith.constant 0 : index
    %47 = vector.load %arg2[%c1, %c0_22, %c0_23] : memref<4x128x128xbf16, #tpu.memory_space<vmem>>, vector<1x128x128xbf16>
    %48 = vector.shape_cast %47 : vector<1x128x128xbf16> to vector<128x128xbf16>
    %cst_24 = arith.constant dense<0.000000e+00> : vector<128x128xf32>
    %49 = tpu.matmul %46, %48, %cst_24 {dimension_numbers = #tpu.dot_dimension_numbers<[1], [0], [0], [1], [0, 0, 1, 1], [], []>} : vector<128x128xbf16>, vector<128x128xbf16>, vector<128x128xf32> -> vector<128x128xf32>
    %c1_25 = arith.constant 1 : index
    %c0_26 = arith.constant 0 : index
    %50 = vector.load %arg3[%c1_25, %c0_26] : memref<4x128xf32, #tpu.memory_space<vmem>>, vector<1x128xf32>
    %51 = vector.broadcast %50 : vector<1x128xf32> to vector<128x128xf32>
    %52 = arith.addf %49, %51 : vector<128x128xf32>
    %53 = arith.addf %8, %52 : vector<128x128xf32>
    %c1_27 = arith.constant 1 : index
    %c0_28 = arith.constant 0 : index
    %54 = vector.load %arg4[%c1_27, %c0_28] : memref<6x128xf32, #tpu.memory_space<vmem>>, vector<1x128xf32>
    %c4 = arith.constant 4 : index
    %c0_29 = arith.constant 0 : index
    %55 = vector.load %arg4[%c4, %c0_29] : memref<6x128xf32, #tpu.memory_space<vmem>>, vector<1x128xf32>
    %cst_30 = arith.constant dense<0.000000e+00> : vector<128xf32>
    %56 = vector.multi_reduction <add>, %53, %cst_30 [0] : vector<128x128xf32> to vector<128xf32>
    %57 = vector.shape_cast %56 : vector<128xf32> to vector<1x128xf32>
    %cst_31 = arith.constant 1.280000e+02 : f32
    %58 = vector.broadcast %cst_31 : f32 to vector<1x128xf32>
    %59 = arith.divf %57, %58 : vector<1x128xf32>
    %60 = arith.mulf %53, %53 : vector<128x128xf32>
    %cst_32 = arith.constant dense<0.000000e+00> : vector<128xf32>
    %61 = vector.multi_reduction <add>, %60, %cst_32 [0] : vector<128x128xf32> to vector<128xf32>
    %62 = vector.shape_cast %61 : vector<128xf32> to vector<1x128xf32>
    %cst_33 = arith.constant 1.280000e+02 : f32
    %63 = vector.broadcast %cst_33 : f32 to vector<1x128xf32>
    %64 = arith.divf %62, %63 : vector<1x128xf32>
    %65 = arith.mulf %59, %59 : vector<1x128xf32>
    %66 = arith.subf %64, %65 : vector<1x128xf32>
    %cst_34 = arith.constant 0.000000e+00 : f32
    %67 = vector.broadcast %cst_34 : f32 to vector<1x128xf32>
    %68 = arith.maximumf %66, %67 : vector<1x128xf32>
    %69 = arith.subf %54, %59 : vector<1x128xf32>
    %cst_35 = arith.constant 9.99999996E-13 : f32
    %70 = vector.broadcast %cst_35 : f32 to vector<1x128xf32>
    %71 = arith.addf %68, %70 : vector<1x128xf32>
    %72 = math.log %71 : vector<1x128xf32>
    %cst_36 = arith.constant 5.000000e-01 : f32
    %73 = vector.broadcast %cst_36 : f32 to vector<1x128xf32>
    %74 = arith.mulf %73, %72 : vector<1x128xf32>
    %cst_37 = arith.constant 0.000000e+00 : f32
    %75 = vector.broadcast %cst_37 : f32 to vector<1x128xf32>
    %76 = arith.subf %75, %74 : vector<1x128xf32>
    %cst_38 = arith.constant 3.000000e+00 : f32
    %77 = vector.broadcast %cst_38 : f32 to vector<1x128xf32>
    %78 = arith.divf %76, %77 : vector<1x128xf32>
    %79 = arith.addf %55, %78 : vector<1x128xf32>
    %cst_39 = arith.constant -5.000000e+00 : f32
    %cst_40 = arith.constant 5.000000e+00 : f32
    %80 = vector.broadcast %cst_39 : f32 to vector<1x128xf32>
    %81 = arith.maximumf %80, %79 : vector<1x128xf32>
    %82 = vector.broadcast %cst_40 : f32 to vector<1x128xf32>
    %83 = arith.minimumf %82, %81 : vector<1x128xf32>
    %84 = math.exp %83 : vector<1x128xf32>
    %85 = vector.broadcast %69 : vector<1x128xf32> to vector<128x128xf32>
    %86 = arith.addf %53, %85 : vector<128x128xf32>
    %87 = vector.broadcast %84 : vector<1x128xf32> to vector<128x128xf32>
    %88 = arith.mulf %86, %87 : vector<128x128xf32>
    %cst_41 = arith.constant 0.000000e+00 : f32
    %89 = vector.broadcast %cst_41 : f32 to vector<128x128xf32>
    %90 = arith.maximumf %88, %89 : vector<128x128xf32>
    %91 = arith.truncf %90 : vector<128x128xf32> to vector<128x128xbf16>
    %c2 = arith.constant 2 : index
    %c0_42 = arith.constant 0 : index
    %c0_43 = arith.constant 0 : index
    %92 = vector.load %arg2[%c2, %c0_42, %c0_43] : memref<4x128x128xbf16, #tpu.memory_space<vmem>>, vector<1x128x128xbf16>
    %93 = vector.shape_cast %92 : vector<1x128x128xbf16> to vector<128x128xbf16>
    %cst_44 = arith.constant dense<0.000000e+00> : vector<128x128xf32>
    %94 = tpu.matmul %91, %93, %cst_44 {dimension_numbers = #tpu.dot_dimension_numbers<[1], [0], [0], [1], [0, 0, 1, 1], [], []>} : vector<128x128xbf16>, vector<128x128xbf16>, vector<128x128xf32> -> vector<128x128xf32>
    %c2_45 = arith.constant 2 : index
    %c0_46 = arith.constant 0 : index
    %95 = vector.load %arg3[%c2_45, %c0_46] : memref<4x128xf32, #tpu.memory_space<vmem>>, vector<1x128xf32>
    %96 = vector.broadcast %95 : vector<1x128xf32> to vector<128x128xf32>
    %97 = arith.addf %94, %96 : vector<128x128xf32>
    %98 = arith.addf %53, %97 : vector<128x128xf32>
    %c2_47 = arith.constant 2 : index
    %c0_48 = arith.constant 0 : index
    %99 = vector.load %arg4[%c2_47, %c0_48] : memref<6x128xf32, #tpu.memory_space<vmem>>, vector<1x128xf32>
    %c5 = arith.constant 5 : index
    %c0_49 = arith.constant 0 : index
    %100 = vector.load %arg4[%c5, %c0_49] : memref<6x128xf32, #tpu.memory_space<vmem>>, vector<1x128xf32>
    %cst_50 = arith.constant dense<0.000000e+00> : vector<128xf32>
    %101 = vector.multi_reduction <add>, %98, %cst_50 [0] : vector<128x128xf32> to vector<128xf32>
    %102 = vector.shape_cast %101 : vector<128xf32> to vector<1x128xf32>
    %cst_51 = arith.constant 1.280000e+02 : f32
    %103 = vector.broadcast %cst_51 : f32 to vector<1x128xf32>
    %104 = arith.divf %102, %103 : vector<1x128xf32>
    %105 = arith.mulf %98, %98 : vector<128x128xf32>
    %cst_52 = arith.constant dense<0.000000e+00> : vector<128xf32>
    %106 = vector.multi_reduction <add>, %105, %cst_52 [0] : vector<128x128xf32> to vector<128xf32>
    %107 = vector.shape_cast %106 : vector<128xf32> to vector<1x128xf32>
    %cst_53 = arith.constant 1.280000e+02 : f32
    %108 = vector.broadcast %cst_53 : f32 to vector<1x128xf32>
    %109 = arith.divf %107, %108 : vector<1x128xf32>
    %110 = arith.mulf %104, %104 : vector<1x128xf32>
    %111 = arith.subf %109, %110 : vector<1x128xf32>
    %cst_54 = arith.constant 0.000000e+00 : f32
    %112 = vector.broadcast %cst_54 : f32 to vector<1x128xf32>
    %113 = arith.maximumf %111, %112 : vector<1x128xf32>
    %114 = arith.subf %99, %104 : vector<1x128xf32>
    %cst_55 = arith.constant 9.99999996E-13 : f32
    %115 = vector.broadcast %cst_55 : f32 to vector<1x128xf32>
    %116 = arith.addf %113, %115 : vector<1x128xf32>
    %117 = math.log %116 : vector<1x128xf32>
    %cst_56 = arith.constant 5.000000e-01 : f32
    %118 = vector.broadcast %cst_56 : f32 to vector<1x128xf32>
    %119 = arith.mulf %118, %117 : vector<1x128xf32>
    %cst_57 = arith.constant 0.000000e+00 : f32
    %120 = vector.broadcast %cst_57 : f32 to vector<1x128xf32>
    %121 = arith.subf %120, %119 : vector<1x128xf32>
    %cst_58 = arith.constant 3.000000e+00 : f32
    %122 = vector.broadcast %cst_58 : f32 to vector<1x128xf32>
    %123 = arith.divf %121, %122 : vector<1x128xf32>
    %124 = arith.addf %100, %123 : vector<1x128xf32>
    %cst_59 = arith.constant -5.000000e+00 : f32
    %cst_60 = arith.constant 5.000000e+00 : f32
    %125 = vector.broadcast %cst_59 : f32 to vector<1x128xf32>
    %126 = arith.maximumf %125, %124 : vector<1x128xf32>
    %127 = vector.broadcast %cst_60 : f32 to vector<1x128xf32>
    %128 = arith.minimumf %127, %126 : vector<1x128xf32>
    %129 = math.exp %128 : vector<1x128xf32>
    %130 = vector.broadcast %114 : vector<1x128xf32> to vector<128x128xf32>
    %131 = arith.addf %98, %130 : vector<128x128xf32>
    %132 = vector.broadcast %129 : vector<1x128xf32> to vector<128x128xf32>
    %133 = arith.mulf %131, %132 : vector<128x128xf32>
    %cst_61 = arith.constant 0.000000e+00 : f32
    %134 = vector.broadcast %cst_61 : f32 to vector<128x128xf32>
    %135 = arith.maximumf %133, %134 : vector<128x128xf32>
    %136 = arith.truncf %135 : vector<128x128xf32> to vector<128x128xbf16>
    %c3_62 = arith.constant 3 : index
    %c0_63 = arith.constant 0 : index
    %c0_64 = arith.constant 0 : index
    %137 = vector.load %arg2[%c3_62, %c0_63, %c0_64] : memref<4x128x128xbf16, #tpu.memory_space<vmem>>, vector<1x128x128xbf16>
    %138 = vector.shape_cast %137 : vector<1x128x128xbf16> to vector<128x128xbf16>
    %cst_65 = arith.constant dense<0.000000e+00> : vector<128x128xf32>
    %139 = tpu.matmul %136, %138, %cst_65 {dimension_numbers = #tpu.dot_dimension_numbers<[1], [0], [0], [1], [0, 0, 1, 1], [], []>} : vector<128x128xbf16>, vector<128x128xbf16>, vector<128x128xf32> -> vector<128x128xf32>
    %c3_66 = arith.constant 3 : index
    %c0_67 = arith.constant 0 : index
    %140 = vector.load %arg3[%c3_66, %c0_67] : memref<4x128xf32, #tpu.memory_space<vmem>>, vector<1x128xf32>
    %141 = vector.broadcast %140 : vector<1x128xf32> to vector<128x128xf32>
    %142 = arith.addf %139, %141 : vector<128x128xf32>
    %143 = tpu.iota {dimensions = array<i32: 1>} : vector<128x128xi32>
    %c0_68 = arith.constant 0 : index
    %144 = memref.load %arg5[%c0_68] : memref<1xf32, #tpu.memory_space<smem>>
    %145 = math.tanh %142 : vector<128x128xf32>
    %cst_69 = arith.constant 9.900000e-01 : f32
    %146 = vector.broadcast %cst_69 : f32 to vector<128x128xf32>
    %147 = arith.mulf %146, %145 : vector<128x128xf32>
    %cst_70 = arith.constant 1.000000e+00 : f32
    %148 = vector.broadcast %cst_70 : f32 to vector<128x128xf32>
    %149 = arith.addf %148, %147 : vector<128x128xf32>
    %150 = vector.broadcast %144 : f32 to vector<128x128xf32>
    %151 = arith.mulf %150, %149 : vector<128x128xf32>
    %c4_i32 = arith.constant 4 : i32
    %152 = vector.broadcast %c4_i32 : i32 to vector<128x128xi32>
    %153 = arith.cmpi slt, %143, %152 : vector<128x128xi32>
    %154 = arith.select %153, %142, %151 : vector<128x128xi1>, vector<128x128xf32>
    %c0_71 = arith.constant 0 : index
    %c0_72 = arith.constant 0 : index
    %c0_73 = arith.constant 0 : index
    %155 = vector.load %arg6[%c0_71, %c0_72, %c0_73] : memref<1x128x128xf32, #tpu.memory_space<vmem>>, vector<1x128x128xf32>
    %156 = vector.shape_cast %155 : vector<1x128x128xf32> to vector<128x128xf32>
    %157 = vector.shape_cast %154 : vector<128x128xf32> to vector<1x128x128xf32>
    tpu.vector_store %arg6[%c0_71, %c0_72, %c0_73], %157 {strides = array<i32>} : memref<1x128x128xf32, #tpu.memory_space<vmem>>, vector<1x128x128xf32>,
    return
  }
  func.func @transform_0(%arg0: i32) -> (i32, i32, i32) {
    %c0_i32 = arith.constant 0 : i32
    %c0_i32_0 = arith.constant 0 : i32
    %c0_i32_1 = arith.constant 0 : i32
    return %arg0, %c0_i32, %c0_i32_0 : i32, i32, i32
  }
  func.func @transform_1(%arg0: i32) -> (i32, i32, i32) {
    %c0_i32 = arith.constant 0 : i32
    %c0_i32_0 = arith.constant 0 : i32
    %c0_i32_1 = arith.constant 0 : i32
    %c0_i32_2 = arith.constant 0 : i32
    return %c0_i32, %c0_i32_0, %c0_i32_1 : i32, i32, i32
  }
  func.func @transform_2(%arg0: i32) -> (i32, i32) {
    %c0_i32 = arith.constant 0 : i32
    %c0_i32_0 = arith.constant 0 : i32
    %c0_i32_1 = arith.constant 0 : i32
    return %c0_i32, %c0_i32_0 : i32, i32
  }
  func.func @transform_3(%arg0: i32) -> (i32, i32) {
    %c0_i32 = arith.constant 0 : i32
    %c0_i32_0 = arith.constant 0 : i32
    %c0_i32_1 = arith.constant 0 : i32
    return %c0_i32, %c0_i32_0 : i32, i32
  }
  func.func @transform_4(%arg0: i32) -> i32 {
    %c0_i32 = arith.constant 0 : i32
    %c0_i32_0 = arith.constant 0 : i32
    return %c0_i32 : i32
  }
  func.func @transform_5(%arg0: i32) -> (i32, i32, i32) {
    %c0_i32 = arith.constant 0 : i32
    %c0_i32_0 = arith.constant 0 : i32
    %c0_i32_1 = arith.constant 0 : i32
    return %arg0, %c0_i32, %c0_i32_0 : i32, i32, i32
  }
}

</mosaic_0001>

<bundles_post_ra>
// kernel: vae_decoder_forward_pallas.1
= control target key start
LH: loop header
LB: loop body
LE: loop exit
PB: predicated region body
PF: predicated region fallthrough
CT: control target
= control target key end

     0   :  { %s1948_s20 = smov 0   ;;  %s2619_s0 = inlined_call_operand.vmem [shape: f32[2,128,128], index: 0, kind: input, shape index: {}]   ;;  %s2620_s1 = inlined_call_operand.vmem [shape: bf16[4,128,128], index: 1, kind: input, shape index: {}]   ;;  %s2621_s2 = inlined_call_operand.vmem [shape: f32[4,128], index: 2, kind: input, shape index: {}]   ;;  %s2622_s3 = inlined_call_operand.vmem [shape: f32[6,128], index: 3, kind: input, shape index: {}]   ;;  %s2623_s4 = inlined_call_operand.<no memory space> [shape: f32[1], index: 4, kind: input, shape index: {}]   ;;  %s2624_s5 = inlined_call_operand.vmem [shape: f32[2,128,128], index: 5, kind: output, shape index: {}]  }
   0x1   :  { %10 = sst [smem:[#allocation2]] %s2623_s4 }
   0x2 LB: > { %s1531_s21 = sadd.s32 4294967295, %s1913_s20   ;;  %p1535_p0 = scmp.ge.s32.totalorder %s1913_s20, 1  ;;  %s1913_s20 = sphi %s1948_s20, %s16_s20  }
   0x3   : > { %p188_p1 = scmp.lt.s32.totalorder %s1913_s20, 3 }
   0x5   : > { %p189_p2 = pnand %p1535_p0, %p188_p1 }
   0x6   : > { %p216_p3 = scmp.lt.s32.totalorder (!%p189_p2), %s1531_s21, 1  ;;  %s1377_s15 = sld [smem:[#allocation2]] (!%p189_p2) }
   0x7   : > { %192 = sbr.rel (%p189_p2) target bundleno = 1209 (0x4b9), region = 40 }
   0xc   : > { %v1831_v0 = vld [vmem:[%s2620_s1 + $0x38] sm:$0xff]   ;;  %v1832_v1 = vld [vmem:[%s2620_s1 + $0x30] sm:$0xff]   ;;  %s2626_s21 = smov (!%p216_p3, %s1531_s21), 1  ;;  %v1833_v2 = vld [vmem:[%s2620_s1 + $0x28] sm:$0xff]  }
   0xd   : > { %1695 = vmatprep.subr.bf16.mxu0 %v1831_v0  ;;  %s1629_s27 = sshll.u32 %s2626_s21, 7  ;;  %v1834_v3 = vld [vmem:[%s2620_s1 + $0x20] sm:$0xff]   ;;  %v1835_v7 = vld [vmem:[%s2620_s1 + $0x18] sm:$0xff]   ;;  %v1836_v8 = vld [vmem:[%s2620_s1 + $0x10] sm:$0xff]  }
   0xe   : > { %1696 = vmatpush3.bf16.msra.mxu0 %v1831_v0  ;;  %s1973_s30 = scalar_lea.vmem %s2619_s0, %s1629_s27  ;;  %v1837_v9 = vld [vmem:[%s2620_s1 + $0x8] sm:$0xff]   ;;  %v1838_v10 = vld [vmem:[%s2620_s1] sm:$0xff]   ;;  %v1839_v32 = vld [vmem:[%s2620_s1 + $0x78] sm:$0xff]   ;;  %s2516_s18 = scalar_lea.vmem %s2624_s5, %s1629_s27 }
   0xf   : > { %1697 = vmatprep.subr.bf16.mxu0 %v1832_v1  ;;  %v227_v4 = vld [vmem:[%s1973_s30] sm:$0xff]  ;;  %v228_v5 = vld [vmem:[%s1973_s30 + $0x8] sm:$0xff]  ;;  %v229_v11 = vld [vmem:[%s1973_s30 + $0x10] sm:$0xff]  ;;  %1727 = vmatprep.subr.bf16.mxu1 %v1839_v32 }
  0x10   : > { %v243_v6 = vpack.c.bf16 %v228_v5, %v227_v4  ;;  %v230_v12 = vld [vmem:[%s1973_s30 + $0x18] sm:$0xff]  ;;  %v231_v13 = vld [vmem:[%s1973_s30 + $0x20] sm:$0xff]  ;;  %v232_v14 = vld [vmem:[%s1973_s30 + $0x28] sm:$0xff]  ;;  %1728 = vmatpush3.bf16.msra.mxu1 %v1839_v32 }
  0x11   : > { %v244_v15 = vpack.c.bf16 %v230_v12, %v229_v11  ;;  %v245_v16 = vpack.c.bf16 %v232_v14, %v231_v13  ;;  %v233_v17 = vld [vmem:[%s1973_s30 + $0x30] sm:$0xff]  ;;  %v234_v18 = vld [vmem:[%s1973_s30 + $0x38] sm:$0xff]  ;;  %v235_v19 = vld [vmem:[%s1973_s30 + $0x40] sm:$0xff] }
  0x12   : > { %1698 = vmatpush3.bf16.msra.mxu0 %v1832_v1  ;;  %1711 = vmatprep.mubr.bf16.mxu0 %v243_v6  ;;  %v236_v20 = vld [vmem:[%s1973_s30 + $0x48] sm:$0xff]  ;;  %v246_v21 = vpack.c.bf16 %v234_v18, %v233_v17  ;;  %v237_v23 = vld [vmem:[%s1973_s30 + $0x50] sm:$0xff]  ;;  %v238_v24 = vld [vmem:[%s1973_s30 + $0x58] sm:$0xff] }
  0x13   : > { %1699 = vmatprep.subr.bf16.mxu0 %v1833_v2  ;;  %v247_v22 = vpack.c.bf16 %v236_v20, %v235_v19  ;;  %v239_v25 = vld [vmem:[%s1973_s30 + $0x60] sm:$0xff]  ;;  %v240_v26 = vld [vmem:[%s1973_s30 + $0x68] sm:$0xff]  ;;  %v248_v27 = vpack.c.bf16 %v238_v24, %v237_v23  ;;  %v241_v29 = vld [vmem:[%s1973_s30 + $0x70] sm:$0xff] }
  0x14   : > { %v249_v28 = vpack.c.bf16 %v240_v26, %v239_v25  ;;  %v242_v30 = vld [vmem:[%s1973_s30 + $0x78] sm:$0xff]  ;;  %v1840_v33 = vld [vmem:[%s2620_s1 + $0x70] sm:$0xff]   ;;  %v1841_v34 = vld [vmem:[%s2620_s1 + $0x68] sm:$0xff]  }
  0x15   : > { %v250_v31 = vpack.c.bf16 %v242_v30, %v241_v29  ;;  %1729 = vmatprep.subr.bf16.mxu1 %v1840_v33  ;;  %v1842_v35 = vld [vmem:[%s2620_s1 + $0x60] sm:$0xff]   ;;  %v1843_v36 = vld [vmem:[%s2620_s1 + $0x58] sm:$0xff]   ;;  %v1844_v37 = vld [vmem:[%s2620_s1 + $0x50] sm:$0xff]  }
  0x16   : > { %1700 = vmatpush3.bf16.msra.mxu0 %v1833_v2  ;;  %1730 = vmatpush3.bf16.msra.mxu1 %v1840_v33  ;;  %v1845_v38 = vld [vmem:[%s2620_s1 + $0x48] sm:$0xff]   ;;  %v1846_v39 = vld [vmem:[%s2620_s1 + $0x40] sm:$0xff]  }
  0x17   : > { %1701 = vmatprep.subr.bf16.mxu0 %v1834_v3  ;;  %1731 = vmatprep.subr.bf16.mxu1 %v1841_v34  ;;  %v2033_v42 = vld [vmem:[%s2621_s2] ss:$0 sm:$0xff] }
  0x1a   : > { %1702 = vmatpush3.bf16.msra.mxu0 %v1834_v3  ;;  %1732 = vmatpush3.bf16.msra.mxu1 %v1841_v34 }
  0x1b   : > { %1703 = vmatprep.subr.bf16.mxu0 %v1835_v7  ;;  %1733 = vmatprep.subr.bf16.mxu1 %v1842_v35 }
  0x1e   : > { %1704 = vmatpush3.bf16.msra.mxu0 %v1835_v7  ;;  %1734 = vmatpush3.bf16.msra.mxu1 %v1842_v35 }
  0x1f   : > { %1705 = vmatprep.subr.bf16.mxu0 %v1836_v8  ;;  %1735 = vmatprep.subr.bf16.mxu1 %v1843_v36 }
  0x22   : > { %1706 = vmatpush3.bf16.msra.mxu0 %v1836_v8  ;;  %1736 = vmatpush3.bf16.msra.mxu1 %v1843_v36 }
  0x23   : > { %1707 = vmatprep.subr.bf16.mxu0 %v1837_v9  ;;  %1737 = vmatprep.subr.bf16.mxu1 %v1844_v37 }
  0x26   : > { %1708 = vmatpush3.bf16.msra.mxu0 %v1837_v9  ;;  %1738 = vmatpush3.bf16.msra.mxu1 %v1844_v37 }
  0x27   : > { %1709 = vmatprep.subr.bf16.mxu0 %v1838_v10  ;;  %1739 = vmatprep.subr.bf16.mxu1 %v1845_v38 }
  0x2a   : > { %1710 = vmatpush3.bf16.msra.mxu0 %v1838_v10  ;;  %1740 = vmatpush3.bf16.msra.mxu1 %v1845_v38 }
  0x2b   : > { %1741 = vmatprep.subr.bf16.mxu1 %v1846_v39 }
  0x2d   : > { %1712 = vmatmul.mubr.bf16.vlgmr.msra.gmra.mxu0 %v244_v15 }
  0x2e   : > { %1715 = vmatprep.mubr.bf16.mxu0 %v245_v16  ;;  %1742 = vmatpush3.bf16.msra.mxu1 %v1846_v39 }
  0x35   : > { %1716 = vmatmul.mubr.bf16.gmra.mxu0 %v246_v21 }
  0x36   : > { %1719 = vmatprep.mubr.bf16.mxu0 %v247_v22 }
  0x3d   : > { %1720 = vmatmul.mubr.bf16.gmra.mxu0 %v248_v27 }
  0x3e   : > { %1723 = vmatprep.mubr.bf16.mxu0 %v249_v28 }
  0x45   : > { %1724 = vmatmul.mubr.bf16.gmra.mxu0 %v250_v31 }
  0xed   : > { %v1713_v40 = vpop.f32.mrf.mxu0 }
  0xee   : > { %v2039_v46 = vadd.f32 %v1713_v40, %v2033_v42 }
  0xef   : > { %v354_v41 = vpop.f32.mrf.mxu0 }
  0xf0   : > { %v2036_v44 = vadd.f32 %v2033_v42, %v354_v41  ;;  %v444_v54 = vmul.f32 %v2039_v46, %v2039_v46 }
  0xf1   : > { %v1714_v43 = vpop.f32.mrf.mxu0 }
  0xf2   : > { %v442_v49 = vmul.f32 %v2036_v44, %v2036_v44  ;;  %v2047_v50 = vadd.f32 %v1714_v43, %v2033_v42 }
  0xf3   : > { %v357_v45 = vpop.f32.mrf.mxu0 }
  0xf4   : > { %v2042_v47 = vadd.f32 %v2033_v42, %v357_v45  ;;  %v445_v59 = vmul.f32 %v2047_v50, %v2047_v50 }
  0xf5   : > { %v1717_v48 = vpop.f32.mrf.mxu0 }
  0xf6   : > { %v419_v51 = vadd.f32 %v2042_v47, %v2036_v44  ;;  %v443_v52 = vmul.f32 %v2042_v47, %v2042_v47  ;;  %v2063_v62 = vadd.f32 %v1717_v48, %v2033_v42 }
  0xf7   : > { %v370_v53 = vpop.f32.mrf.mxu0 }
  0xf8   : > { %v420_v55 = vadd.f32 %v419_v51, %v2039_v46  ;;  %v458_v56 = vadd.f32 %v443_v52, %v442_v49  ;;  %v2057_v57 = vadd.f32 %v2033_v42, %v370_v53  ;;  %v448_v10 = vmul.f32 %v2063_v62, %v2063_v62 }
  0xf9   : > { %v1718_v58 = vpop.f32.mrf.mxu0 }
  0xfa   : > { %v459_v60 = vadd.f32 %v458_v56, %v444_v54  ;;  %v421_v61 = vadd.f32 %v420_v55, %v2047_v50  ;;  %v446_v1 = vmul.f32 %v2057_v57, %v2057_v57  ;;  %v2072_v6 = vadd.f32 %v1718_v58, %v2033_v42 }
  0xfb   : > { %v373_v63 = vpop.f32.mrf.mxu0 }
  0xfc   : > { %v422_v0 = vadd.f32 %v421_v61, %v2057_v57  ;;  %v460_v2 = vadd.f32 %v459_v60, %v445_v59  ;;  %v2069_v3 = vadd.f32 %v2033_v42, %v373_v63  ;;  %v449_v15 = vmul.f32 %v2072_v6, %v2072_v6 }
  0xfd   : > { %v1721_v4 = vpop.f32.mrf.mxu0 }
  0xfe   : > { %v461_v5 = vadd.f32 %v460_v2, %v446_v1  ;;  %v423_v7 = vadd.f32 %v422_v0, %v2069_v3  ;;  %v447_v8 = vmul.f32 %v2069_v3, %v2069_v3  ;;  %v2087_v18 = vadd.f32 %v1721_v4, %v2033_v42 }
  0xff   : > { %v386_v9 = vpop.f32.mrf.mxu0 }
 0x100   : > { %v424_v11 = vadd.f32 %v423_v7, %v2063_v62  ;;  %v462_v12 = vadd.f32 %v461_v5, %v447_v8  ;;  %v2081_v13 = vadd.f32 %v2033_v42, %v386_v9  ;;  %v452_v30 = vmul.f32 %v2087_v18, %v2087_v18 }
 0x101   : > { %v1722_v14 = vpop.f32.mrf.mxu0 }
 0x102   : > { %v463_v16 = vadd.f32 %v462_v12, %v448_v10  ;;  %v425_v17 = vadd.f32 %v424_v11, %v2072_v6  ;;  %v450_v21 = vmul.f32 %v2081_v13, %v2081_v13  ;;  %v2096_v26 = vadd.f32 %v1722_v14, %v2033_v42 }
 0x103   : > { %v389_v19 = vpop.f32.mrf.mxu0 }
 0x104   : > { %v426_v20 = vadd.f32 %v425_v17, %v2081_v13  ;;  %v464_v22 = vadd.f32 %v463_v16, %v449_v15  ;;  %v2093_v23 = vadd.f32 %v2033_v42, %v389_v19  ;;  %v453_v35 = vmul.f32 %v2096_v26, %v2096_v26 }
 0x105   : > { %v1725_v24 = vpop.f32.mrf.mxu0 }
 0x106   : > { %v465_v25 = vadd.f32 %v464_v22, %v450_v21  ;;  %v427_v27 = vadd.f32 %v426_v20, %v2093_v23  ;;  %v451_v28 = vmul.f32 %v2093_v23, %v2093_v23  ;;  %v2111_v38 = vadd.f32 %v1725_v24, %v2033_v42  ;;  %v418_v24 = vld [vmem:[%s2622_s3 + $0x3] sm:$0x1] }
 0x107   : > { %v402_v29 = vpop.f32.mrf.mxu0 }
 0x108   : > { %v428_v31 = vadd.f32 %v427_v27, %v2087_v18  ;;  %v466_v32 = vadd.f32 %v465_v25, %v451_v28  ;;  %v2105_v33 = vadd.f32 %v2033_v42, %v402_v29  ;;  %v456_v53 = vmul.f32 %v2111_v38, %v2111_v38 }
 0x109   : > { %v1726_v34 = vpop.f32.mrf.mxu0  ;;  %v496_v29 = vlaneseq }
 0x10a   : > { %v467_v36 = vadd.f32 %v466_v32, %v452_v30  ;;  %v429_v37 = vadd.f32 %v428_v31, %v2096_v26  ;;  %v454_v41 = vmul.f32 %v2105_v33, %v2105_v33  ;;  %v2120_v49 = vadd.f32 %v1726_v34, %v2033_v42  ;;  %v417_v32 = vld [vmem:[%s2622_s3] sm:$0x1] }
 0x10b   : > { %v405_v39 = vpop.f32.mrf.mxu0  ;;  %v497_v31 = vshrl.u32 %v496_v29, 7 }
 0x10c   : > { %v430_v40 = vadd.f32 %v429_v37, %v2105_v33  ;;  %v468_v43 = vadd.f32 %v467_v36, %v453_v35  ;;  %v2117_v45 = vadd.f32 %v2033_v42, %v405_v39  ;;  %v457_v56 = vmul.f32 %v2120_v49, %v2120_v49 }
 0x10d   : > { %v2138_v35 = vsub.s32 0, %v497_v31 }
 0x10e   : > { %v469_v48 = vadd.f32 %v468_v43, %v454_v41  ;;  %v431_v51 = vadd.f32 %v430_v40, %v2117_v45  ;;  %v455_v52 = vmul.f32 %v2117_v45, %v2117_v45 }
 0x110   : > { %v432_v54 = vadd.f32 %v431_v51, %v2111_v38  ;;  %v470_v55 = vadd.f32 %v469_v48, %v455_v52 }
 0x112   : > { %v433_v58 = vadd.f32 %v432_v54, %v2120_v49  ;;  %v471_v59 = vadd.f32 %v470_v55, %v456_v53 }
 0x114   : > { %v434_v60 = vrot.slane %v433_v58, 4  ;;  %v472_v42 = vadd.f32 %v471_v59, %v457_v56 }
 0x116   : > { %v435_v61 = vadd.f32 %v434_v60, %v433_v58  ;;  %v473_v63 = vrot.slane %v472_v42, 4 }
 0x118   : > { %v436_v0 = vrot.slane %v435_v61, 2  ;;  %v474_v1 = vadd.f32 %v473_v63, %v472_v42 }
 0x11a   : > { %v437_v2 = vadd.f32 %v436_v0, %v435_v61  ;;  %v475_v4 = vrot.slane %v474_v1, 2 }
 0x11c   : > { %v438_v5 = vrot.slane %v437_v2, 1  ;;  %v476_v7 = vadd.f32 %v475_v4, %v474_v1 }
 0x11e   : > { %v439_v8 = vadd.f32 %v438_v5, %v437_v2  ;;  %v477_v9 = vrot.slane %v476_v7, 1 }
 0x120   : > { %v441_v10 = vmul.f32 0.0078125, %v439_v8  ;;  %v478_v11 = vadd.f32 %v477_v9, %v476_v7 }
 0x122   : > { %v479_v12 = vmul.f32 0.0078125, %v478_v11  ;;  %v480_v14 = vmul.f32 %v441_v10, %v441_v10  ;;  %v483_v34 = vsub.f32 %v417_v32, %v441_v10 }
 0x124   : > { %v481_v15 = vsub.f32 %v479_v12, %v480_v14  ;;  %v499_v36 = vrot.slane %v483_v34, %v2138_v35 }
 0x126   : > { %v482_v16 = vmax.f32 %v481_v15, 0.0  ;;  %v500_v39 = vadd.f32 %v499_v36, %v2036_v44  ;;  %v501_v41 = vadd.f32 %v499_v36, %v2042_v47  ;;  %v502_v43 = vadd.f32 %v499_v36, %v2039_v46 }
 0x127   : > { %v503_v48 = vadd.f32 %v499_v36, %v2047_v50  ;;  %v504_v51 = vadd.f32 %v499_v36, %v2057_v57  ;;  %v505_v52 = vadd.f32 %v499_v36, %v2069_v3  ;;  %v506_v2 = vadd.f32 %v499_v36, %v2063_v62 }
 0x128   : > { %v484_v17 = vadd.f32 1e-12, %v482_v16  ;;  %v507_v4 = vadd.f32 %v499_v36, %v2072_v6  ;;  %v508_v8 = vadd.f32 %v499_v36, %v2081_v13  ;;  %v509_v9 = vadd.f32 %v499_v36, %v2093_v23 }
 0x12a   : > { %1863 = vlog2.f32 %v484_v17 }
 0x137   : > { %v1864_v19 = vpop.eup %1863 }
 0x138   : > { %v486_v20 = vmul.f32 0.6931472, %v1864_v19 }
 0x13a   : > { %v487_v21 = vmul.f32 0.5, %v486_v20 }
 0x13c   : > { %v488_v22 = vsub.f32 0.0, %v487_v21  ;;  %v510_v21 = vadd.f32 %v499_v36, %v2087_v18 }
 0x13e   : > { %v490_v25 = vmul.f32 0.33333334, %v488_v22  ;;  %v511_v22 = vadd.f32 %v499_v36, %v2096_v26 }
 0x140   : > { %v491_v27 = vadd.f32 %v490_v25, %v418_v24  ;;  %v512_v24 = vadd.f32 %v499_v36, %v2105_v33  ;;  %v513_v25 = vadd.f32 %v499_v36, %v2117_v45 }
 0x142   : > { %v1549_v28 = vclamps-f32 %v491_v27, 5.0 }
 0x144   : > { %v494_v30 = vmul.f32 1.442695, %v1549_v28 }
 0x146   : > { %1865 = vpow2.f32 %v494_v30 }
 0x153   : > { %v1866_v37 = vpop.eup %1865 }
 0x154   : > { %v519_v40 = vrot.slane %v1866_v37, %v2138_v35 }
 0x156   : > { %v520_v53 = vmul.f32 %v519_v40, %v500_v39  ;;  %v521_v54 = vmul.f32 %v519_v40, %v501_v41  ;;  %v522_v55 = vmul.f32 %v519_v40, %v502_v43  ;;  %v523_v56 = vmul.f32 %v519_v40, %v503_v48 }
 0x157   : > { %v524_v58 = vmul.f32 %v519_v40, %v504_v51  ;;  %v525_v59 = vmul.f32 %v519_v40, %v505_v52  ;;  %v526_v10 = vmul.f32 %v519_v40, %v506_v2  ;;  %v527_v11 = vmul.f32 %v519_v40, %v507_v4  ;;  %v2185_v4 = vld [vmem:[%s2621_s2 + $0x1] ss:$0 sm:$0xff] }
 0x158   : > { %v536_v60 = vmax.f32 %v520_v53, 0.0  ;;  %v537_v42 = vmax.f32 %v521_v54, 0.0  ;;  %v538_v61 = vmax.f32 %v522_v55, 0.0  ;;  %v539_v63 = vmax.f32 %v523_v56, 0.0 }
 0x159   : > { %v540_v0 = vmax.f32 %v524_v58, 0.0  ;;  %v541_v1 = vmax.f32 %v525_v59, 0.0  ;;  %v528_v14 = vmul.f32 %v519_v40, %v508_v8  ;;  %v529_v15 = vmul.f32 %v519_v40, %v509_v9 }
 0x15a   : > { %v552_v5 = vpack.c.bf16 %v537_v42, %v536_v60  ;;  %v553_v7 = vpack.c.bf16 %v539_v63, %v538_v61  ;;  %v542_v16 = vmax.f32 %v526_v10, 0.0  ;;  %v543_v17 = vmax.f32 %v527_v11, 0.0  ;;  %v1847_v60 = vld [vmem:[%s2620_s1 + $0xb8] sm:$0xff]   ;;  %v1850_v42 = vld [vmem:[%s2620_s1 + $0xa0] sm:$0xff]   ;;  %v1852_v63 = vld [vmem:[%s2620_s1 + $0x90] sm:$0xff]  }
 0x15b   : > { %v554_v12 = vpack.c.bf16 %v541_v1, %v540_v0  ;;  %v544_v19 = vmax.f32 %v528_v14, 0.0  ;;  %v545_v20 = vmax.f32 %v529_v15, 0.0  ;;  %v530_v28 = vmul.f32 %v519_v40, %v510_v21  ;;  %1759 = vmatprep.subr.bf16.mxu0 %v1847_v60  ;;  %v1851_v61 = vld [vmem:[%s2620_s1 + $0x98] sm:$0xff]   ;;  %v1853_v0 = vld [vmem:[%s2620_s1 + $0x88] sm:$0xff]   ;;  %v1854_v1 = vld [vmem:[%s2620_s1 + $0x80] sm:$0xff]  }
 0x15c   : > { %1743 = vmatprep.mubr.bf16.mxu1 %v552_v5  ;;  %v555_v27 = vpack.c.bf16 %v543_v17, %v542_v16  ;;  %v531_v30 = vmul.f32 %v519_v40, %v511_v22  ;;  %v532_v32 = vmul.f32 %v519_v40, %v512_v24  ;;  %v533_v34 = vmul.f32 %v519_v40, %v513_v25 }
 0x15d   : > { %1744 = vmatmul.mubr.bf16.vlgmr.msra.gmra.mxu1 %v553_v7  ;;  %v556_v31 = vpack.c.bf16 %v545_v20, %v544_v19  ;;  %v546_v37 = vmax.f32 %v530_v28, 0.0  ;;  %v514_v48 = vadd.f32 %v499_v36, %v2111_v38  ;;  %v515_v51 = vadd.f32 %v499_v36, %v2120_v49  ;;  %1760 = vmatpush3.bf16.msra.mxu0 %v1847_v60  ;;  %v1848_v36 = vld [vmem:[%s2620_s1 + $0xb0] sm:$0xff]  }
 0x15e   : > { %1747 = vmatprep.mubr.bf16.mxu1 %v554_v12  ;;  %v547_v39 = vmax.f32 %v531_v30, 0.0  ;;  %v548_v41 = vmax.f32 %v532_v32, 0.0  ;;  %v549_v43 = vmax.f32 %v533_v34, 0.0  ;;  %1761 = vmatprep.subr.bf16.mxu0 %v1848_v36 }
 0x15f   : > { %v534_v53 = vmul.f32 %v519_v40, %v514_v48  ;;  %v535_v54 = vmul.f32 %v519_v40, %v515_v51  ;;  %v1849_v40 = vld [vmem:[%s2620_s1 + $0xa8] sm:$0xff]  }
 0x160   : > { %v557_v52 = vpack.c.bf16 %v547_v39, %v546_v37  ;;  %v558_v55 = vpack.c.bf16 %v549_v43, %v548_v41 }
 0x161   : > { %v550_v56 = vmax.f32 %v534_v53, 0.0  ;;  %v551_v58 = vmax.f32 %v535_v54, 0.0  ;;  %1762 = vmatpush3.bf16.msra.mxu0 %v1848_v36 }
 0x162   : > { %1763 = vmatprep.subr.bf16.mxu0 %v1849_v40 }
 0x163   : > { %v559_v59 = vpack.c.bf16 %v551_v58, %v550_v56 }
 0x165   : > { %1748 = vmatmul.mubr.bf16.gmra.mxu1 %v555_v27  ;;  %1764 = vmatpush3.bf16.msra.mxu0 %v1849_v40 }
 0x166   : > { %1751 = vmatprep.mubr.bf16.mxu1 %v556_v31  ;;  %1765 = vmatprep.subr.bf16.mxu0 %v1850_v42 }
 0x169   : > { %1766 = vmatpush3.bf16.msra.mxu0 %v1850_v42 }
 0x16a   : > { %1767 = vmatprep.subr.bf16.mxu0 %v1851_v61 }
 0x16d   : > { %1752 = vmatmul.mubr.bf16.gmra.mxu1 %v557_v52  ;;  %1768 = vmatpush3.bf16.msra.mxu0 %v1851_v61 }
 0x16e   : > { %1755 = vmatprep.mubr.bf16.mxu1 %v558_v55  ;;  %1769 = vmatprep.subr.bf16.mxu0 %v1852_v63 }
 0x171   : > { %1770 = vmatpush3.bf16.msra.mxu0 %v1852_v63 }
 0x172   : > { %1771 = vmatprep.subr.bf16.mxu0 %v1853_v0 }
 0x175   : > { %1756 = vmatmul.mubr.bf16.gmra.mxu1 %v559_v59  ;;  %1772 = vmatpush3.bf16.msra.mxu0 %v1853_v0 }
 0x176   : > { %1773 = vmatprep.subr.bf16.mxu0 %v1854_v1 }
 0x179   : > { %1774 = vmatpush3.bf16.msra.mxu0 %v1854_v1 }
 0x21d   : > { %v1745_v2 = vpop.f32.mrf.mxu1 }
 0x21e   : > { %v673_v9 = vadd.f32 %v1745_v2, %v2185_v4 }
 0x21f   : > { %v664_v5 = vpop.f32.mrf.mxu1 }
 0x220   : > { %v665_v7 = vadd.f32 %v2185_v4, %v664_v5  ;;  %v2195_v16 = vadd.f32 %v673_v9, %v2039_v46 }
 0x221   : > { %v1746_v8 = vpop.f32.mrf.mxu1 }
 0x222   : > { %v676_v10 = vadd.f32 %v1746_v8, %v2185_v4  ;;  %v2191_v12 = vadd.f32 %v665_v7, %v2036_v44 }
 0x223   : > { %v667_v11 = vpop.f32.mrf.mxu1 }
 0x224   : > { %v668_v14 = vadd.f32 %v2185_v4, %v667_v11  ;;  %v2201_v19 = vadd.f32 %v676_v10, %v2047_v50  ;;  %v767_v21 = vmul.f32 %v2191_v12, %v2191_v12 }
 0x225   : > { %v1749_v15 = vpop.f32.mrf.mxu1 }
 0x226   : > { %v2198_v17 = vadd.f32 %v668_v14, %v2042_v47  ;;  %v689_v46 = vadd.f32 %v1749_v15, %v2185_v4  ;;  %v769_v47 = vmul.f32 %v2195_v16, %v2195_v16  ;;  %v770_v30 = vmul.f32 %v2201_v19, %v2201_v19 }
 0x227   : > { %v680_v20 = vpop.f32.mrf.mxu1 }
 0x228   : > { %v745_v44 = vadd.f32 %v2198_v17, %v2191_v12  ;;  %v768_v22 = vmul.f32 %v2198_v17, %v2198_v17  ;;  %v681_v24 = vadd.f32 %v2185_v4, %v680_v20  ;;  %v2223_v41 = vadd.f32 %v689_v46, %v2063_v62 }
 0x229   : > { %v1750_v25 = vpop.f32.mrf.mxu1 }
 0x22a   : > { %v746_v50 = vadd.f32 %v745_v44, %v2195_v16  ;;  %v783_v27 = vadd.f32 %v768_v22, %v767_v21  ;;  %v2215_v28 = vadd.f32 %v681_v24, %v2057_v57  ;;  %v692_v37 = vadd.f32 %v1750_v25, %v2185_v4 }
 0x22b   : > { %v683_v31 = vpop.f32.mrf.mxu1  ;;  %v773_v36 = vmul.f32 %v2223_v41, %v2223_v41 }
 0x22c   : > { %v784_v32 = vadd.f32 %v783_v27, %v769_v47  ;;  %v747_v34 = vadd.f32 %v746_v50, %v2201_v19  ;;  %v684_v39 = vadd.f32 %v2185_v4, %v683_v31  ;;  %v771_v57 = vmul.f32 %v2215_v28, %v2215_v28 }
 0x22d   : > { %v1753_v43 = vpop.f32.mrf.mxu1  ;;  %v2232_v55 = vadd.f32 %v692_v37, %v2072_v6 }
 0x22e   : > { %v748_v48 = vadd.f32 %v747_v34, %v2215_v28  ;;  %v785_v51 = vadd.f32 %v784_v32, %v770_v30  ;;  %v2229_v52 = vadd.f32 %v684_v39, %v2069_v3  ;;  %v705_v58 = vadd.f32 %v1753_v43, %v2185_v4 }
 0x22f   : > { %v696_v53 = vpop.f32.mrf.mxu1  ;;  %v774_v63 = vmul.f32 %v2232_v55, %v2232_v55 }
 0x230   : > { %v786_v54 = vadd.f32 %v785_v51, %v771_v57  ;;  %v749_v56 = vadd.f32 %v748_v48, %v2229_v52  ;;  %v772_v62 = vmul.f32 %v2229_v52, %v2229_v52  ;;  %v697_v59 = vadd.f32 %v2185_v4, %v696_v53 }
 0x231   : > { %v1754_v60 = vpop.f32.mrf.mxu1  ;;  %v2251_v5 = vadd.f32 %v705_v58, %v2087_v18 }
 0x232   : > { %v750_v3 = vadd.f32 %v749_v56, %v2223_v41  ;;  %v787_v40 = vadd.f32 %v786_v54, %v772_v62  ;;  %v2243_v42 = vadd.f32 %v697_v59, %v2081_v13  ;;  %v708_v6 = vadd.f32 %v1754_v60, %v2185_v4 }
 0x233   : > { %v699_v61 = vpop.f32.mrf.mxu1  ;;  %v777_v22 = vmul.f32 %v2251_v5, %v2251_v5 }
 0x234   : > { %v788_v0 = vadd.f32 %v787_v40, %v773_v36  ;;  %v751_v1 = vadd.f32 %v750_v3, %v2232_v55  ;;  %v700_v2 = vadd.f32 %v2185_v4, %v699_v61  ;;  %v775_v13 = vmul.f32 %v2243_v42, %v2243_v42 }
 0x235   : > { %v1757_v7 = vpop.f32.mrf.mxu1  ;;  %v2260_v11 = vadd.f32 %v708_v6, %v2096_v26 }
 0x236   : > { %v752_v8 = vadd.f32 %v751_v1, %v2243_v42  ;;  %v789_v9 = vadd.f32 %v788_v0, %v774_v63  ;;  %v2257_v10 = vadd.f32 %v700_v2, %v2093_v23  ;;  %v721_v26 = vadd.f32 %v1757_v7, %v2185_v4 }
 0x237   : > { %v712_v14 = vpop.f32.mrf.mxu1  ;;  %v778_v47 = vmul.f32 %v2260_v11, %v2260_v11 }
 0x238   : > { %v790_v15 = vadd.f32 %v789_v9, %v775_v13  ;;  %v753_v20 = vadd.f32 %v752_v8, %v2257_v10  ;;  %v776_v18 = vmul.f32 %v2257_v10, %v2257_v10  ;;  %v713_v21 = vadd.f32 %v2185_v4, %v712_v14 }
 0x239   : > { %v1758_v44 = vpop.f32.mrf.mxu1  ;;  %v2282_v37 = vadd.f32 %v721_v26, %v2111_v38 }
 0x23a   : > { %v754_v24 = vadd.f32 %v753_v20, %v2251_v5  ;;  %v791_v23 = vadd.f32 %v790_v15, %v776_v18  ;;  %v2270_v46 = vadd.f32 %v713_v21, %v2105_v33  ;;  %v724_v30 = vadd.f32 %v1758_v44, %v2185_v4  ;;  %v744_v44 = vld [vmem:[%s2622_s3 + $0x4] sm:$0x1] }
 0x23b   : > { %v715_v25 = vpop.f32.mrf.mxu1  ;;  %v781_v51 = vmul.f32 %v2282_v37, %v2282_v37 }
 0x23c   : > { %v792_v50 = vadd.f32 %v791_v23, %v777_v22  ;;  %v755_v27 = vadd.f32 %v754_v24, %v2260_v11  ;;  %v716_v31 = vadd.f32 %v2185_v4, %v715_v25  ;;  %v779_v34 = vmul.f32 %v2270_v46, %v2270_v46  ;;  %v743_v25 = vld [vmem:[%s2622_s3 + $0x1] sm:$0x1] }
 0x23d   : > { %v2288_v48 = vadd.f32 %v724_v30, %v2120_v49 }
 0x23e   : > { %v756_v32 = vadd.f32 %v755_v27, %v2270_v46  ;;  %v793_v33 = vadd.f32 %v792_v50, %v778_v47  ;;  %v2285_v39 = vadd.f32 %v716_v31, %v2117_v45 }
 0x23f   : > { %v782_v38 = vmul.f32 %v2288_v48, %v2288_v48 }
 0x240   : > { %v794_v43 = vadd.f32 %v793_v33, %v779_v34  ;;  %v757_v57 = vadd.f32 %v756_v32, %v2285_v39  ;;  %v780_v4 = vmul.f32 %v2285_v39, %v2285_v39 }
 0x242   : > { %v758_v53 = vadd.f32 %v757_v57, %v2282_v37  ;;  %v795_v54 = vadd.f32 %v794_v43, %v780_v4 }
 0x244   : > { %v759_v45 = vadd.f32 %v758_v53, %v2288_v48  ;;  %v796_v56 = vadd.f32 %v795_v54, %v781_v51 }
 0x246   : > { %v760_v62 = vrot.slane %v759_v45, 4  ;;  %v797_v49 = vadd.f32 %v796_v56, %v782_v38 }
 0x248   : > { %v761_v58 = vadd.f32 %v760_v62, %v759_v45  ;;  %v798_v59 = vrot.slane %v797_v49, 4 }
 0x24a   : > { %v762_v60 = vrot.slane %v761_v58, 2  ;;  %v799_v36 = vadd.f32 %v798_v59, %v797_v49 }
 0x24c   : > { %v763_v3 = vadd.f32 %v762_v60, %v761_v58  ;;  %v800_v40 = vrot.slane %v799_v36, 2 }
 0x24e   : > { %v764_v6 = vrot.slane %v763_v3, 1  ;;  %v801_v61 = vadd.f32 %v800_v40, %v799_v36 }
 0x250   : > { %v765_v63 = vadd.f32 %v764_v6, %v763_v3  ;;  %v802_v0 = vrot.slane %v801_v61, 1 }
 0x252   : > { %v766_v1 = vmul.f32 0.0078125, %v765_v63  ;;  %v803_v2 = vadd.f32 %v802_v0, %v801_v61 }
 0x254   : > { %v804_v7 = vmul.f32 0.0078125, %v803_v2  ;;  %v805_v8 = vmul.f32 %v766_v1, %v766_v1  ;;  %v808_v47 = vsub.f32 %v743_v25, %v766_v1 }
 0x256   : > { %v806_v13 = vsub.f32 %v804_v7, %v805_v8  ;;  %v823_v50 = vrot.slane %v808_v47, %v2138_v35 }
 0x258   : > { %v807_v9 = vmax.f32 %v806_v13, 0.0  ;;  %v824_v30 = vadd.f32 %v823_v50, %v2191_v12  ;;  %v825_v32 = vadd.f32 %v823_v50, %v2198_v17  ;;  %v826_v34 = vadd.f32 %v823_v50, %v2195_v16 }
 0x259   : > { %v827_v33 = vadd.f32 %v823_v50, %v2201_v19  ;;  %v828_v43 = vadd.f32 %v823_v50, %v2215_v28  ;;  %v829_v57 = vadd.f32 %v823_v50, %v2229_v52  ;;  %v830_v36 = vadd.f32 %v823_v50, %v2223_v41 }
 0x25a   : > { %v809_v14 = vadd.f32 1e-12, %v807_v9  ;;  %v831_v3 = vadd.f32 %v823_v50, %v2232_v55  ;;  %v832_v61 = vadd.f32 %v823_v50, %v2243_v42  ;;  %v833_v63 = vadd.f32 %v823_v50, %v2257_v10 }
 0x25c   : > { %1867 = vlog2.f32 %v809_v14 }
 0x269   : > { %v1868_v15 = vpop.eup %1867 }
 0x26a   : > { %v811_v20 = vmul.f32 0.6931472, %v1868_v15 }
 0x26c   : > { %v812_v18 = vmul.f32 0.5, %v811_v20  ;;  %v834_v20 = vadd.f32 %v823_v50, %v2251_v5 }
 0x26e   : > { %v813_v21 = vsub.f32 0.0, %v812_v18  ;;  %v835_v18 = vadd.f32 %v823_v50, %v2260_v11 }
 0x270   : > { %v814_v22 = vmul.f32 0.33333334, %v813_v21  ;;  %v836_v21 = vadd.f32 %v823_v50, %v2270_v46 }
 0x272   : > { %v815_v24 = vadd.f32 %v814_v22, %v744_v44  ;;  %v837_v44 = vadd.f32 %v823_v50, %v2285_v39 }
 0x274   : > { %v1575_v23 = vclamps-f32 %v815_v24, 5.0 }
 0x276   : > { %v818_v26 = vmul.f32 1.442695, %v1575_v23 }
 0x278   : > { %1869 = vpow2.f32 %v818_v26 }
 0x285   : > { %v1870_v27 = vpop.eup %1869 }
 0x286   : > { %v843_v31 = vrot.slane %v1870_v27, %v2138_v35 }
 0x288   : > { %v844_v4 = vmul.f32 %v843_v31, %v824_v30  ;;  %v845_v51 = vmul.f32 %v843_v31, %v825_v32  ;;  %v846_v53 = vmul.f32 %v843_v31, %v826_v34  ;;  %v847_v54 = vmul.f32 %v843_v31, %v827_v33 }
 0x289   : > { %v848_v38 = vmul.f32 %v843_v31, %v828_v43  ;;  %v849_v45 = vmul.f32 %v843_v31, %v829_v57  ;;  %v850_v0 = vmul.f32 %v843_v31, %v830_v36  ;;  %v851_v1 = vmul.f32 %v843_v31, %v831_v3  ;;  %v2350_v3 = vld [vmem:[%s2621_s2 + $0x2] ss:$0 sm:$0xff] }
 0x28a   : > { %v860_v56 = vmax.f32 %v844_v4, 0.0  ;;  %v861_v62 = vmax.f32 %v845_v51, 0.0  ;;  %v862_v49 = vmax.f32 %v846_v53, 0.0  ;;  %v863_v58 = vmax.f32 %v847_v54, 0.0 }
 0x28b   : > { %v864_v59 = vmax.f32 %v848_v38, 0.0  ;;  %v865_v60 = vmax.f32 %v849_v45, 0.0  ;;  %v852_v7 = vmul.f32 %v843_v31, %v832_v61  ;;  %v853_v8 = vmul.f32 %v843_v31, %v833_v63 }
 0x28c   : > { %v876_v40 = vpack.c.bf16 %v861_v62, %v860_v56  ;;  %v877_v6 = vpack.c.bf16 %v863_v58, %v862_v49  ;;  %v866_v13 = vmax.f32 %v850_v0, 0.0  ;;  %v867_v9 = vmax.f32 %v851_v1, 0.0  ;;  %v1855_v56 = vld [vmem:[%s2620_s1 + $0xf8] sm:$0xff]   ;;  %v1858_v62 = vld [vmem:[%s2620_s1 + $0xe0] sm:$0xff]   ;;  %v1860_v58 = vld [vmem:[%s2620_s1 + $0xd0] sm:$0xff]  }
 0x28d   : > { %v878_v2 = vpack.c.bf16 %v865_v60, %v864_v59  ;;  %v868_v14 = vmax.f32 %v852_v7, 0.0  ;;  %v869_v15 = vmax.f32 %v853_v8, 0.0  ;;  %v854_v24 = vmul.f32 %v843_v31, %v834_v20  ;;  %1791 = vmatprep.subr.bf16.mxu1 %v1855_v56  ;;  %v1859_v49 = vld [vmem:[%s2620_s1 + $0xd8] sm:$0xff]   ;;  %v1861_v59 = vld [vmem:[%s2620_s1 + $0xc8] sm:$0xff]   ;;  %v1862_v60 = vld [vmem:[%s2620_s1 + $0xc0] sm:$0xff]  }
 0x28e   : > { %1775 = vmatprep.mubr.bf16.mxu0 %v876_v40  ;;  %v879_v22 = vpack.c.bf16 %v867_v9, %v866_v13  ;;  %v855_v23 = vmul.f32 %v843_v31, %v835_v18  ;;  %v856_v25 = vmul.f32 %v843_v31, %v836_v21  ;;  %v857_v47 = vmul.f32 %v843_v31, %v837_v44 }
 0x28f   : > { %1776 = vmatmul.mubr.bf16.vlgmr.msra.gmra.mxu0 %v877_v6  ;;  %v880_v26 = vpack.c.bf16 %v869_v15, %v868_v14  ;;  %v870_v27 = vmax.f32 %v854_v24, 0.0  ;;  %v838_v33 = vadd.f32 %v823_v50, %v2282_v37  ;;  %v839_v43 = vadd.f32 %v823_v50, %v2288_v48  ;;  %1792 = vmatpush3.bf16.msra.mxu1 %v1855_v56  ;;  %v1856_v50 = vld [vmem:[%s2620_s1 + $0xf0] sm:$0xff]  }
 0x290   : > { %1779 = vmatprep.mubr.bf16.mxu0 %v878_v2  ;;  %v871_v30 = vmax.f32 %v855_v23, 0.0  ;;  %v872_v32 = vmax.f32 %v856_v25, 0.0  ;;  %v873_v34 = vmax.f32 %v857_v47, 0.0  ;;  %1793 = vmatprep.subr.bf16.mxu1 %v1856_v50 }
 0x291   : > { %v858_v4 = vmul.f32 %v843_v31, %v838_v33  ;;  %v859_v51 = vmul.f32 %v843_v31, %v839_v43  ;;  %v1857_v31 = vld [vmem:[%s2620_s1 + $0xe8] sm:$0xff]  }
 0x292   : > { %v881_v57 = vpack.c.bf16 %v871_v30, %v870_v27  ;;  %v882_v53 = vpack.c.bf16 %v873_v34, %v872_v32 }
 0x293   : > { %v874_v54 = vmax.f32 %v858_v4, 0.0  ;;  %v875_v38 = vmax.f32 %v859_v51, 0.0  ;;  %1794 = vmatpush3.bf16.msra.mxu1 %v1856_v50 }
 0x294   : > { %1795 = vmatprep.subr.bf16.mxu1 %v1857_v31 }
 0x295   : > { %v883_v45 = vpack.c.bf16 %v875_v38, %v874_v54 }
 0x297   : > { %1780 = vmatmul.mubr.bf16.gmra.mxu0 %v879_v22  ;;  %1796 = vmatpush3.bf16.msra.mxu1 %v1857_v31 }
 0x298   : > { %1783 = vmatprep.mubr.bf16.mxu0 %v880_v26  ;;  %1797 = vmatprep.subr.bf16.mxu1 %v1858_v62 }
 0x29b   : > { %1798 = vmatpush3.bf16.msra.mxu1 %v1858_v62 }
 0x29c   : > { %1799 = vmatprep.subr.bf16.mxu1 %v1859_v49 }
 0x29f   : > { %1784 = vmatmul.mubr.bf16.gmra.mxu0 %v881_v57  ;;  %1800 = vmatpush3.bf16.msra.mxu1 %v1859_v49 }
 0x2a0   : > { %1787 = vmatprep.mubr.bf16.mxu0 %v882_v53  ;;  %1801 = vmatprep.subr.bf16.mxu1 %v1860_v58 }
 0x2a3   : > { %1802 = vmatpush3.bf16.msra.mxu1 %v1860_v58 }
 0x2a4   : > { %1803 = vmatprep.subr.bf16.mxu1 %v1861_v59 }
 0x2a7   : > { %1788 = vmatmul.mubr.bf16.gmra.mxu0 %v883_v45  ;;  %1804 = vmatpush3.bf16.msra.mxu1 %v1861_v59 }
 0x2a8   : > { %1805 = vmatprep.subr.bf16.mxu1 %v1862_v60 }
 0x2ab   : > { %1806 = vmatpush3.bf16.msra.mxu1 %v1862_v60 }
 0x34f   : > { %v1777_v36 = vpop.f32.mrf.mxu0 }
 0x350   : > { %v997_v63 = vadd.f32 %v1777_v36, %v2350_v3 }
 0x351   : > { %v988_v40 = vpop.f32.mrf.mxu0 }
 0x352   : > { %v989_v6 = vadd.f32 %v2350_v3, %v988_v40  ;;  %v2360_v13 = vadd.f32 %v997_v63, %v2195_v16 }
 0x353   : > { %v1778_v61 = vpop.f32.mrf.mxu0 }
 0x354   : > { %v1000_v0 = vadd.f32 %v1778_v61, %v2350_v3  ;;  %v2356_v2 = vadd.f32 %v989_v6, %v2191_v12 }
 0x355   : > { %v991_v1 = vpop.f32.mrf.mxu0 }
 0x356   : > { %v992_v7 = vadd.f32 %v2350_v3, %v991_v1  ;;  %v2366_v14 = vadd.f32 %v1000_v0, %v2201_v19  ;;  %v1091_v20 = vmul.f32 %v2356_v2, %v2356_v2 }
 0x357   : > { %v1781_v8 = vpop.f32.mrf.mxu0 }
 0x358   : > { %v2363_v9 = vadd.f32 %v992_v7, %v2198_v17  ;;  %v1013_v16 = vadd.f32 %v1781_v8, %v2350_v3  ;;  %v1093_v17 = vmul.f32 %v2360_v13, %v2360_v13  ;;  %v1094_v23 = vmul.f32 %v2366_v14, %v2366_v14 }
 0x359   : > { %v1004_v15 = vpop.f32.mrf.mxu0 }
 0x35a   : > { %v1069_v12 = vadd.f32 %v2363_v9, %v2356_v2  ;;  %v1092_v18 = vmul.f32 %v2363_v9, %v2363_v9  ;;  %v1005_v21 = vadd.f32 %v2350_v3, %v1004_v15  ;;  %v2388_v32 = vadd.f32 %v1013_v16, %v2223_v41 }
 0x35b   : > { %v1782_v44 = vpop.f32.mrf.mxu0 }
 0x35c   : > { %v1070_v19 = vadd.f32 %v1069_v12, %v2360_v13  ;;  %v1107_v22 = vadd.f32 %v1092_v18, %v1091_v20  ;;  %v2380_v24 = vadd.f32 %v1005_v21, %v2215_v28  ;;  %v1016_v27 = vadd.f32 %v1782_v44, %v2350_v3 }
 0x35d   : > { %v1007_v26 = vpop.f32.mrf.mxu0  ;;  %v1097_v50 = vmul.f32 %v2388_v32, %v2388_v32 }
 0x35e   : > { %v1108_v25 = vadd.f32 %v1107_v22, %v1093_v17  ;;  %v1071_v47 = vadd.f32 %v1070_v19, %v2366_v14  ;;  %v1008_v30 = vadd.f32 %v2350_v3, %v1007_v26  ;;  %v1095_v28 = vmul.f32 %v2380_v24, %v2380_v24 }
 0x35f   : > { %v1785_v34 = vpop.f32.mrf.mxu0  ;;  %v2397_v53 = vadd.f32 %v1016_v27, %v2232_v55 }
 0x360   : > { %v1072_v33 = vadd.f32 %v1071_v47, %v2380_v24  ;;  %v1109_v43 = vadd.f32 %v1108_v25, %v1094_v23  ;;  %v2394_v57 = vadd.f32 %v1008_v30, %v2229_v52  ;;  %v1029_v38 = vadd.f32 %v1785_v34, %v2350_v3 }
 0x361   : > { %v1020_v4 = vpop.f32.mrf.mxu0  ;;  %v1098_v58 = vmul.f32 %v2397_v53, %v2397_v53 }
 0x362   : > { %v1110_v51 = vadd.f32 %v1109_v43, %v1095_v28  ;;  %v1073_v54 = vadd.f32 %v1072_v33, %v2394_v57  ;;  %v1096_v41 = vmul.f32 %v2394_v57, %v2394_v57  ;;  %v1021_v45 = vadd.f32 %v2350_v3, %v1020_v4 }
 0x363   : > { %v1786_v56 = vpop.f32.mrf.mxu0  ;;  %v2416_v40 = vadd.f32 %v1029_v38, %v2251_v5 }
 0x364   : > { %v1074_v52 = vadd.f32 %v1073_v54, %v2388_v32  ;;  %v1111_v31 = vadd.f32 %v1110_v51, %v1096_v41  ;;  %v2408_v62 = vadd.f32 %v1021_v45, %v2243_v42  ;;  %v1032_v55 = vadd.f32 %v1786_v56, %v2350_v3 }
 0x365   : > { %v1023_v49 = vpop.f32.mrf.mxu0  ;;  %v1101_v18 = vmul.f32 %v2416_v40, %v2416_v40 }
 0x366   : > { %v1112_v59 = vadd.f32 %v1111_v31, %v1097_v50  ;;  %v1075_v60 = vadd.f32 %v1074_v52, %v2397_v53  ;;  %v1024_v36 = vadd.f32 %v2350_v3, %v1023_v49  ;;  %v1099_v42 = vmul.f32 %v2408_v62, %v2408_v62 }
 0x367   : > { %v1789_v6 = vpop.f32.mrf.mxu0  ;;  %v2425_v1 = vadd.f32 %v1032_v55, %v2260_v11 }
 0x368   : > { %v1076_v61 = vadd.f32 %v1075_v60, %v2408_v62  ;;  %v1113_v63 = vadd.f32 %v1112_v59, %v1098_v58  ;;  %v2422_v0 = vadd.f32 %v1024_v36, %v2257_v10  ;;  %v1045_v11 = vadd.f32 %v1789_v6, %v2350_v3 }
 0x369   : > { %v1036_v7 = vpop.f32.mrf.mxu0  ;;  %v1102_v17 = vmul.f32 %v2425_v1, %v2425_v1 }
 0x36a   : > { %v1114_v8 = vadd.f32 %v1113_v63, %v1099_v42  ;;  %v1077_v15 = vadd.f32 %v1076_v61, %v2422_v0  ;;  %v1100_v5 = vmul.f32 %v2422_v0, %v2422_v0  ;;  %v1037_v20 = vadd.f32 %v2350_v3, %v1036_v7 }
 0x36b   : > { %v1790_v12 = vpop.f32.mrf.mxu0  ;;  %v1065_v27 = vadd.f32 %v1045_v11, %v2282_v37 }
 0x36c   : > { %v1078_v21 = vadd.f32 %v1077_v15, %v2416_v40  ;;  %v1115_v10 = vadd.f32 %v1114_v8, %v1100_v5  ;;  %v2435_v16 = vadd.f32 %v1037_v20, %v2270_v46  ;;  %v1048_v23 = vadd.f32 %v1790_v12, %v2350_v3  ;;  %v1068_v12 = vld [vmem:[%s2622_s3 + $0x5] sm:$0x1] }
 0x36d   : > { %v1039_v44 = vpop.f32.mrf.mxu0  ;;  %v1105_v4 = vmul.f32 %v1065_v27, %v1065_v27 }
 0x36e   : > { %v1116_v19 = vadd.f32 %v1115_v10, %v1101_v18  ;;  %v1079_v22 = vadd.f32 %v1078_v21, %v2425_v1  ;;  %v1040_v26 = vadd.f32 %v2350_v3, %v1039_v44  ;;  %v1103_v47 = vmul.f32 %v2435_v16, %v2435_v16  ;;  %v1067_v44 = vld [vmem:[%s2622_s3 + $0x2] sm:$0x1] }
 0x36f   : > { %v1066_v33 = vadd.f32 %v1048_v23, %v2288_v48 }
 0x370   : > { %v1080_v25 = vadd.f32 %v1079_v22, %v2435_v16  ;;  %v1117_v46 = vadd.f32 %v1116_v19, %v1102_v17  ;;  %v1064_v30 = vadd.f32 %v1040_v26, %v2285_v39 }
 0x371   : > { %v1106_v41 = vmul.f32 %v1066_v33, %v1066_v33 }
 0x372   : > { %v1118_v34 = vadd.f32 %v1117_v46, %v1103_v47  ;;  %v1081_v28 = vadd.f32 %v1080_v25, %v1064_v30  ;;  %v1104_v43 = vmul.f32 %v1064_v30, %v1064_v30 }
 0x374   : > { %v1082_v51 = vadd.f32 %v1081_v28, %v1065_v27  ;;  %v1119_v54 = vadd.f32 %v1118_v34, %v1104_v43 }
 0x376   : > { %v1083_v3 = vadd.f32 %v1082_v51, %v1066_v33  ;;  %v1120_v38 = vadd.f32 %v1119_v54, %v1105_v4 }
 0x378   : > { %v1084_v45 = vrot.slane %v1083_v3, 4  ;;  %v1121_v56 = vadd.f32 %v1120_v38, %v1106_v41 }
 0x37a   : > { %v1085_v50 = vadd.f32 %v1084_v45, %v1083_v3  ;;  %v1122_v52 = vrot.slane %v1121_v56, 4 }
 0x37c   : > { %v1086_v31 = vrot.slane %v1085_v50, 2  ;;  %v1123_v55 = vadd.f32 %v1122_v52, %v1121_v56 }
 0x37e   : > { %v1087_v37 = vadd.f32 %v1086_v31, %v1085_v50  ;;  %v1124_v49 = vrot.slane %v1123_v55, 2 }
 0x380   : > { %v1088_v39 = vrot.slane %v1087_v37, 1  ;;  %v1125_v58 = vadd.f32 %v1124_v49, %v1123_v55 }
 0x382   : > { %v1089_v59 = vadd.f32 %v1088_v39, %v1087_v37  ;;  %v1126_v48 = vrot.slane %v1125_v58, 1 }
 0x384   : > { %v1090_v60 = vmul.f32 0.0078125, %v1089_v59  ;;  %v1127_v36 = vadd.f32 %v1126_v48, %v1125_v58 }
 0x386   : > { %v1128_v6 = vmul.f32 0.0078125, %v1127_v36  ;;  %v1129_v61 = vmul.f32 %v1090_v60, %v1090_v60  ;;  %v1132_v17 = vsub.f32 %v1067_v44, %v1090_v60 }
 0x388   : > { %v1130_v42 = vsub.f32 %v1128_v6, %v1129_v61  ;;  %v1147_v19 = vrot.slane %v1132_v17, %v2138_v35 }
 0x38a   : > { %v1131_v63 = vmax.f32 %v1130_v42, 0.0  ;;  %v1161_v22 = vadd.f32 %v1147_v19, %v1064_v30  ;;  %v1148_v23 = vadd.f32 %v1147_v19, %v2356_v2  ;;  %v1149_v26 = vadd.f32 %v1147_v19, %v2363_v9 }
 0x38b   : > { %v1150_v25 = vadd.f32 %v1147_v19, %v2360_v13  ;;  %v1151_v47 = vadd.f32 %v1147_v19, %v2366_v14  ;;  %v1152_v34 = vadd.f32 %v1147_v19, %v2380_v24  ;;  %v1153_v28 = vadd.f32 %v1147_v19, %v2394_v57 }
 0x38c   : > { %v1133_v7 = vadd.f32 1e-12, %v1131_v63  ;;  %v1154_v43 = vadd.f32 %v1147_v19, %v2388_v32  ;;  %v1155_v4 = vadd.f32 %v1147_v19, %v2397_v53  ;;  %v1156_v30 = vadd.f32 %v1147_v19, %v2408_v62 }
 0x38d   : > { %v1157_v2 = vadd.f32 %v1147_v19, %v2422_v0  ;;  %v1158_v9 = vadd.f32 %v1147_v19, %v2416_v40  ;;  %v1159_v13 = vadd.f32 %v1147_v19, %v2425_v1  ;;  %v1160_v14 = vadd.f32 %v1147_v19, %v2435_v16 }
 0x38e   : > { %1871 = vlog2.f32 %v1133_v7  ;;  %v1162_v54 = vadd.f32 %v1147_v19, %v1065_v27  ;;  %v1163_v24 = vadd.f32 %v1147_v19, %v1066_v33 }
 0x39b   : > { %v1872_v8 = vpop.eup %1871 }
 0x39c   : > { %v1135_v15 = vmul.f32 0.6931472, %v1872_v8 }
 0x39e   : > { %v1136_v5 = vmul.f32 0.5, %v1135_v15 }
 0x3a0   : > { %v1137_v20 = vsub.f32 0.0, %v1136_v5 }
 0x3a2   : > { %v1138_v18 = vmul.f32 0.33333334, %v1137_v20 }
 0x3a4   : > { %v1139_v21 = vadd.f32 %v1138_v18, %v1068_v12 }
 0x3a6   : > { %v1601_v10 = vclamps-f32 %v1139_v21, 5.0 }
 0x3a8   : > { %v1142_v11 = vmul.f32 1.442695, %v1601_v10  ;;  %v2473_v10 = vld [vmem:[%s2621_s2 + $0x3] ss:$0 sm:$0xff] }
 0x3aa   : > { %1873 = vpow2.f32 %v1142_v11 }
 0x3b7   : > { %v1874_v46 = vpop.eup %1873 }
 0x3b8   : > { %v1167_v51 = vrot.slane %v1874_v46, %v2138_v35 }
 0x3ba   : > { %v1168_v41 = vmul.f32 %v1167_v51, %v1148_v23  ;;  %v1169_v57 = vmul.f32 %v1167_v51, %v1149_v26  ;;  %v1170_v3 = vmul.f32 %v1167_v51, %v1150_v25  ;;  %v1171_v32 = vmul.f32 %v1167_v51, %v1151_v47 }
 0x3bb   : > { %v1172_v38 = vmul.f32 %v1167_v51, %v1152_v34  ;;  %v1173_v53 = vmul.f32 %v1167_v51, %v1153_v28  ;;  %v1174_v45 = vmul.f32 %v1167_v51, %v1154_v43  ;;  %v1175_v35 = vmul.f32 %v1167_v51, %v1155_v4 }
 0x3bc   : > { %v1184_v56 = vmax.f32 %v1168_v41, 0.0  ;;  %v1185_v62 = vmax.f32 %v1169_v57, 0.0  ;;  %v1186_v50 = vmax.f32 %v1170_v3, 0.0  ;;  %v1187_v0 = vmax.f32 %v1171_v32, 0.0 }
 0x3bd   : > { %v1188_v52 = vmax.f32 %v1172_v38, 0.0  ;;  %v1189_v40 = vmax.f32 %v1173_v53, 0.0  ;;  %v1190_v31 = vmax.f32 %v1174_v45, 0.0  ;;  %v1191_v1 = vmax.f32 %v1175_v35, 0.0 }
 0x3be   : > { %v1200_v55 = vpack.c.bf16 %v1185_v62, %v1184_v56  ;;  %v1201_v16 = vpack.c.bf16 %v1187_v0, %v1186_v50  ;;  %v1176_v27 = vmul.f32 %v1167_v51, %v1156_v30  ;;  %v1177_v33 = vmul.f32 %v1167_v51, %v1157_v2 }
 0x3bf   : > { %v1202_v37 = vpack.c.bf16 %v1189_v40, %v1188_v52  ;;  %v1203_v49 = vpack.c.bf16 %v1191_v1, %v1190_v31  ;;  %v1178_v39 = vmul.f32 %v1167_v51, %v1158_v9  ;;  %v1179_v58 = vmul.f32 %v1167_v51, %v1159_v13 }
 0x3c0   : > { %1807 = vmatprep.mubr.bf16.mxu1 %v1200_v55  ;;  %v1192_v59 = vmax.f32 %v1176_v27, 0.0  ;;  %v1193_v48 = vmax.f32 %v1177_v33, 0.0  ;;  %v1180_v60 = vmul.f32 %v1167_v51, %v1160_v14  ;;  %v1181_v36 = vmul.f32 %v1167_v51, %v1161_v22 }
 0x3c1   : > { %1808 = vmatmul.mubr.bf16.vlgmr.msra.gmra.mxu1 %v1201_v16  ;;  %v1194_v6 = vmax.f32 %v1178_v39, 0.0  ;;  %v1195_v61 = vmax.f32 %v1179_v58, 0.0  ;;  %v1182_v42 = vmul.f32 %v1167_v51, %v1162_v54  ;;  %v1183_v63 = vmul.f32 %v1167_v51, %v1163_v24 }
 0x3c2   : > { %1811 = vmatprep.mubr.bf16.mxu1 %v1202_v37  ;;  %v1204_v7 = vpack.c.bf16 %v1193_v48, %v1192_v59  ;;  %v1196_v8 = vmax.f32 %v1180_v60, 0.0  ;;  %v1197_v15 = vmax.f32 %v1181_v36, 0.0  ;;  %v2498_v9 = vand.u32 127, %v496_v29 }
 0x3c3   : > { %v1205_v5 = vpack.c.bf16 %v1195_v61, %v1194_v6  ;;  %v1198_v20 = vmax.f32 %v1182_v42, 0.0  ;;  %v1199_v12 = vmax.f32 %v1183_v63, 0.0  ;;  %v2504_v41 = vstv %s1377_s15 }
 0x3c4   : > { %v1206_v18 = vpack.c.bf16 %v1197_v15, %v1196_v8  ;;  %vm1443_vm0 = vcmp.lt.s32.totalorder %v2498_v9, 4 }
 0x3c5   : > { %v1207_v21 = vpack.c.bf16 %v1199_v12, %v1198_v20 }
 0x3c9   : > { %1812 = vmatmul.mubr.bf16.gmra.mxu1 %v1203_v49 }
 0x3ca   : > { %1815 = vmatprep.mubr.bf16.mxu1 %v1204_v7 }
 0x3d1   : > { %1816 = vmatmul.mubr.bf16.gmra.mxu1 %v1205_v5 }
 0x3d2   : > { %1819 = vmatprep.mubr.bf16.mxu1 %v1206_v18 }
 0x3d9   : > { %1820 = vmatmul.mubr.bf16.gmra.mxu1 %v1207_v21 }
 0x481   : > { %v1809_v11 = vpop.f32.mrf.mxu1 }
 0x482   : > { %v1321_v44 = vadd.f32 %v1809_v11, %v2473_v10 }
 0x483   : > { %v1312_v17 = vpop.f32.mrf.mxu1 }
 0x484   : > { %1875 = vtanh.f32 %v1321_v44  ;;  %v1313_v19 = vadd.f32 %v2473_v10, %v1312_v17 }
 0x485   : > { %v1810_v22 = vpop.f32.mrf.mxu1 }
 0x486   : > { %1877 = vtanh.f32 %v1313_v19  ;;  %v1324_v23 = vadd.f32 %v1810_v22, %v2473_v10 }
 0x487   : > { %v1315_v26 = vpop.f32.mrf.mxu1 }
 0x488   : > { %1879 = vtanh.f32 %v1324_v23  ;;  %v2479_v25 = vadd.f32 %v2473_v10, %v1315_v26 }
 0x489   : > { %v1813_v47 = vpop.f32.mrf.mxu1 }
 0x48a   : > { %1881 = vtanh.f32 %v2479_v25  ;;  %v2483_v46 = vadd.f32 %v1813_v47, %v2473_v10 }
 0x48b   : > { %v1328_v34 = vpop.f32.mrf.mxu1 }
 0x48c   : > { %1883 = vtanh.f32 %v2483_v46  ;;  %v2487_v28 = vadd.f32 %v2473_v10, %v1328_v34 }
 0x48d   : > { %v1814_v43 = vpop.f32.mrf.mxu1 }
 0x48e   : > { %1885 = vtanh.f32 %v2487_v28  ;;  %v2491_v4 = vadd.f32 %v1814_v43, %v2473_v10 }
 0x48f   : > { %v1331_v51 = vpop.f32.mrf.mxu1 }
 0x490   : > { %1887 = vtanh.f32 %v2491_v4  ;;  %v2495_v30 = vadd.f32 %v2473_v10, %v1331_v51 }
 0x491   : > { %v1876_v2 = vpop.eup %1875  ;;  %v1817_v13 = vpop.f32.mrf.mxu1 }
 0x492   : > { %v1396_v14 = vmul.f32 0.99, %v1876_v2  ;;  %1889 = vtanh.f32 %v2495_v30  ;;  %v2502_v54 = vadd.f32 %v1817_v13, %v2473_v10 }
 0x493   : > { %v1878_v24 = vpop.eup %1877  ;;  %v1344_v57 = vpop.f32.mrf.mxu1 }
 0x494   : > { %v1412_v3 = vadd.f32 1.0, %v1396_v14  ;;  %v1394_v32 = vmul.f32 0.99, %v1878_v24  ;;  %1891 = vtanh.f32 %v2502_v54  ;;  %v2508_v38 = vadd.f32 %v2473_v10, %v1344_v57 }
 0x495   : > { %v1880_v29 = vpop.eup %1879  ;;  %v1818_v53 = vpop.f32.mrf.mxu1 }
 0x496   : > { %v1429_v45 = vmul.f32 %v2504_v41, %v1412_v3  ;;  %v1410_v35 = vadd.f32 1.0, %v1394_v32  ;;  %v1397_v56 = vmul.f32 0.99, %v1880_v29  ;;  %1893 = vtanh.f32 %v2508_v38 }
 0x497   : > { %v1882_v62 = vpop.eup %1881  ;;  %v2521_v50 = vadd.f32 %v1818_v53, %v2473_v10  ;;  %v1347_v0 = vpop.f32.mrf.mxu1 }
 0x498   : > { %v1446_v52 = vsel %vm1443_vm0, %v1321_v44, %v1429_v45  ;;  %v1427_v40 = vmul.f32 %v2504_v41, %v1410_v35  ;;  %v1413_v31 = vadd.f32 1.0, %v1397_v56  ;;  %v1395_v1 = vmul.f32 0.99, %v1882_v62 }
 0x499   : > { %v1884_v55 = vpop.eup %1883  ;;  %1462 = vst [vmem:[%s2516_s18 + $0x10] sm:$0xff] %v1446_v52  ;;  %1895 = vtanh.f32 %v2521_v50  ;;  %v2529_v16 = vadd.f32 %v2473_v10, %v1347_v0  ;;  %v1821_v27 = vpop.f32.mrf.mxu1 }
 0x49a   : > { %v1444_v33 = vsel %vm1443_vm0, %v1313_v19, %v1427_v40  ;;  %v1430_v37 = vmul.f32 %v2504_v41, %v1413_v31  ;;  %v1411_v49 = vadd.f32 1.0, %v1395_v1  ;;  %v1400_v39 = vmul.f32 0.99, %v1884_v55 }
 0x49b   : > { %v1886_v58 = vpop.eup %1885  ;;  %1460 = vst [vmem:[%s2516_s18] sm:$0xff] %v1444_v33  ;;  %1897 = vtanh.f32 %v2529_v16  ;;  %v2537_v59 = vadd.f32 %v1821_v27, %v2473_v10  ;;  %v1360_v48 = vpop.f32.mrf.mxu1 }
 0x49c   : > { %v1447_v60 = vsel %vm1443_vm0, %v1324_v23, %v1430_v37  ;;  %v1428_v36 = vmul.f32 %v2504_v41, %v1411_v49  ;;  %v1416_v6 = vadd.f32 1.0, %v1400_v39  ;;  %v1398_v61 = vmul.f32 0.99, %v1886_v58 }
 0x49d   : > { %v1888_v42 = vpop.eup %1887  ;;  %1463 = vst [vmem:[%s2516_s18 + $0x18] sm:$0xff] %v1447_v60  ;;  %1899 = vtanh.f32 %v2537_v59  ;;  %v2545_v63 = vadd.f32 %v2473_v10, %v1360_v48  ;;  %v1822_v7 = vpop.f32.mrf.mxu1 }
 0x49e   : > { %v1445_v8 = vsel %vm1443_vm0, %v2479_v25, %v1428_v36  ;;  %v1433_v15 = vmul.f32 %v2504_v41, %v1416_v6  ;;  %v1414_v5 = vadd.f32 1.0, %v1398_v61  ;;  %v1401_v20 = vmul.f32 0.99, %v1888_v42 }
 0x49f   : > { %v1890_v12 = vpop.eup %1889  ;;  %1461 = vst [vmem:[%s2516_s18 + $0x8] sm:$0xff] %v1445_v8  ;;  %1901 = vtanh.f32 %v2545_v63  ;;  %v2554_v18 = vadd.f32 %v1822_v7, %v2473_v10  ;;  %v1363_v21 = vpop.f32.mrf.mxu1 }
 0x4a0   : > { %v1450_v11 = vsel %vm1443_vm0, %v2483_v46, %v1433_v15  ;;  %v1431_v44 = vmul.f32 %v2504_v41, %v1414_v5  ;;  %v1417_v17 = vadd.f32 1.0, %v1401_v20  ;;  %v1399_v19 = vmul.f32 0.99, %v1890_v12 }
 0x4a1   : > { %v1892_v22 = vpop.eup %1891  ;;  %1466 = vst [vmem:[%s2516_s18 + $0x30] sm:$0xff] %v1450_v11  ;;  %1903 = vtanh.f32 %v2554_v18  ;;  %v1364_v23 = vadd.f32 %v2473_v10, %v1363_v21 }
 0x4a2   : > { %v1448_v26 = vsel %vm1443_vm0, %v2487_v28, %v1431_v44  ;;  %v1434_v25 = vmul.f32 %v2504_v41, %v1417_v17  ;;  %v1415_v47 = vadd.f32 1.0, %v1399_v19  ;;  %v1404_v46 = vmul.f32 0.99, %v1892_v22 }
 0x4a3   : > { %v1894_v34 = vpop.eup %1893  ;;  %1464 = vst [vmem:[%s2516_s18 + $0x20] sm:$0xff] %v1448_v26  ;;  %1905 = vtanh.f32 %v1364_v23 }
 0x4a4   : > { %v1451_v43 = vsel %vm1443_vm0, %v2491_v4, %v1434_v25  ;;  %v1432_v51 = vmul.f32 %v2504_v41, %v1415_v47  ;;  %v1420_v10 = vadd.f32 1.0, %v1404_v46  ;;  %v1402_v2 = vmul.f32 0.99, %v1894_v34 }
 0x4a5   : > { %1467 = vst [vmem:[%s2516_s18 + $0x38] sm:$0xff] %v1451_v43 }
 0x4a6   : > { %v1896_v28 = vpop.eup %1895  ;;  %v1449_v13 = vsel %vm1443_vm0, %v2495_v30, %v1432_v51  ;;  %v1437_v14 = vmul.f32 %v2504_v41, %v1420_v10  ;;  %v1418_v24 = vadd.f32 1.0, %v1402_v2 }
 0x4a7   : > { %1465 = vst [vmem:[%s2516_s18 + $0x28] sm:$0xff] %v1449_v13  ;;  %v1405_v57 = vmul.f32 0.99, %v1896_v28 }
 0x4a8   : > { %v1898_v3 = vpop.eup %1897  ;;  %v1454_v4 = vsel %vm1443_vm0, %v2502_v54, %v1437_v14  ;;  %v1435_v32 = vmul.f32 %v2504_v41, %v1418_v24 }
 0x4a9   : > { %1470 = vst [vmem:[%s2516_s18 + $0x50] sm:$0xff] %v1454_v4  ;;  %v1421_v29 = vadd.f32 1.0, %v1405_v57  ;;  %v1403_v53 = vmul.f32 0.99, %v1898_v3 }
 0x4aa   : > { %v1900_v45 = vpop.eup %1899  ;;  %v1452_v30 = vsel %vm1443_vm0, %v2508_v38, %v1435_v32 }
 0x4ab   : > { %1468 = vst [vmem:[%s2516_s18 + $0x40] sm:$0xff] %v1452_v30  ;;  %v1438_v35 = vmul.f32 %v2504_v41, %v1421_v29  ;;  %v1419_v56 = vadd.f32 1.0, %v1403_v53  ;;  %v1408_v62 = vmul.f32 0.99, %v1900_v45 }
 0x4ac   : > { %v1902_v0 = vpop.eup %1901 }
 0x4ad   : > { %v1455_v54 = vsel %vm1443_vm0, %v2521_v50, %v1438_v35  ;;  %v1436_v52 = vmul.f32 %v2504_v41, %v1419_v56  ;;  %v1424_v40 = vadd.f32 1.0, %v1408_v62  ;;  %v1406_v31 = vmul.f32 0.99, %v1902_v0 }
 0x4ae   : > { %v1904_v1 = vpop.eup %1903  ;;  %1471 = vst [vmem:[%s2516_s18 + $0x58] sm:$0xff] %v1455_v54 }
 0x4af   : > { %v1453_v38 = vsel %vm1443_vm0, %v2529_v16, %v1436_v52  ;;  %v1441_v55 = vmul.f32 %v2504_v41, %v1424_v40  ;;  %v1422_v27 = vadd.f32 1.0, %v1406_v31  ;;  %v1409_v33 = vmul.f32 0.99, %v1904_v1 }
 0x4b0   : > { %v1906_v37 = vpop.eup %1905  ;;  %1469 = vst [vmem:[%s2516_s18 + $0x48] sm:$0xff] %v1453_v38 }
 0x4b1   : > { %v1458_v50 = vsel %vm1443_vm0, %v2537_v59, %v1441_v55  ;;  %v1439_v49 = vmul.f32 %v2504_v41, %v1422_v27  ;;  %v1425_v39 = vadd.f32 1.0, %v1409_v33  ;;  %v1407_v58 = vmul.f32 0.99, %v1906_v37 }
 0x4b2   : > { %1474 = vst [vmem:[%s2516_s18 + $0x70] sm:$0xff] %v1458_v50 }
 0x4b3   : > { %v1456_v16 = vsel %vm1443_vm0, %v2545_v63, %v1439_v49  ;;  %v1442_v48 = vmul.f32 %v2504_v41, %v1425_v39  ;;  %v1423_v60 = vadd.f32 1.0, %v1407_v58 }
 0x4b4   : > { %1472 = vst [vmem:[%s2516_s18 + $0x60] sm:$0xff] %v1456_v16 }
 0x4b5   : > { %v1459_v36 = vsel %vm1443_vm0, %v2554_v18, %v1442_v48  ;;  %v1440_v6 = vmul.f32 %v2504_v41, %v1423_v60 }
 0x4b6   : > { %1475 = vst [vmem:[%s2516_s18 + $0x78] sm:$0xff] %v1459_v36 }
 0x4b7   : > { %v1457_v59 = vsel %vm1443_vm0, %v1364_v23, %v1440_v6 }
 0x4b8   : > { %1473 = vst [vmem:[%s2516_s18 + $0x68] sm:$0xff] %v1457_v59 }
 0x4b9 PF: > { %s16_s20 = sadd.s32 1, %s1913_s20  }
 0x4ba   : > { %p13_p4 = scmp.ge.s32.totalorder %s16_s20, 4  }
 0x4bc   :  { %15 = sbr.rel (!%p13_p4) target bundleno = 2 (0x2), region = 73 }

</bundles_post_ra>
